<compile_context>
chip_gen: v5e
topology: v5e:2x2
jax: 0.10.0
libtpu: 0.0.40
codegen_flags: <defaults>
</compile_context>

<pallas_src>
import functools

import jax
import jax.numpy as jnp
import numpy as np
from jax.experimental import pallas as pl
from jax.experimental.pallas import tpu as pltpu


def _round_up(v, m):
    return ((v + m - 1) // m) * m


# ----------------------------------------------------------------------------
# compute_pooling_at_each_layer (plain JAX glue, matches the torch version)
# ----------------------------------------------------------------------------
def compute_pooling_at_each_layer(pooling_dim_at_output, num_layers):
    py, px = map(int, pooling_dim_at_output.split('x'))
    pooling_base = jnp.array([1.0 / px, 1.0 / py, 1.0], dtype=jnp.float32)
    poolings = []
    for i in range(num_layers):
        pooling = pooling_base / 2 ** (3 - i)
        pooling = pooling.at[-1].set(1.0)
        poolings.append(pooling)
    return jnp.stack(poolings)


# ----------------------------------------------------------------------------
# Per-node trilinear corner data (align_corners=True, zero padding), with the
# dx pair folded.  For each of the 4 (batch, y) corner pairs:
#   bi4  (4,N) int32 : batch index of the corner pair
#   row4 (4,N) int32 : flat H*W index (y*W + x0) of the dx=0 corner
#   w0s  (4,N) f32   : weight of the dx=0 corner (y/x/b validity folded in)
#   w1s  (4,N) f32   : weight of the dx=1 corner
# NOTE: degenerate width/height/Wf/Hf == 1 would divide by zero, exactly as the
# torch reference does.
# ----------------------------------------------------------------------------
def _corner_data(pos, batch, B, Hf, Wf, width, height):
    xf = pos[:, 0] * width
    yf = pos[:, 1] * height
    bs = B if B > 1 else 2
    ix = xf * (Wf - 1) / (width - 1)
    iy = yf * (Hf - 1) / (height - 1)
    ib = batch.astype(jnp.float32) * (B - 1) / (bs - 1)

    x0 = jnp.floor(ix)
    y0 = jnp.floor(iy)
    b0 = jnp.floor(ib)
    fx = ix - x0
    fy = iy - y0
    fb = ib - b0
    x0i = x0.astype(jnp.int32)
    y0i = y0.astype(jnp.int32)
    b0i = b0.astype(jnp.int32)

    vx0 = ((x0i >= 0) & (x0i < Wf)).astype(jnp.float32)
    vx1 = ((x0i + 1 >= 0) & (x0i + 1 < Wf)).astype(jnp.float32)

    bi_rows, row_rows, w0_rows, w1_rows = [], [], [], []
    for db in (0, 1):
        wb = fb if db else (1.0 - fb)
        bi = b0i + db
        vb = ((bi >= 0) & (bi < B)).astype(jnp.float32)
        for dy in (0, 1):
            wy = fy if dy else (1.0 - fy)
            yi = y0i + dy
            vy = ((yi >= 0) & (yi < Hf)).astype(jnp.float32)
            w = wb * wy * vb * vy
            bi_rows.append(bi)
            row_rows.append(yi * Wf + x0i)
            w0_rows.append(w * (1.0 - fx) * vx0)
            w1_rows.append(w * fx * vx1)

    return (jnp.stack(bi_rows).astype(jnp.int32),
            jnp.stack(row_rows).astype(jnp.int32),
            jnp.stack(w0_rows).astype(jnp.float32),
            jnp.stack(w1_rows).astype(jnp.float32))


# ----------------------------------------------------------------------------
# Fused sampling_skip kernel.
# Grid: (node tile i [parallel], batch b [arbitrary], HW tile k [arbitrary]).
# The lane-dense output block (cx_pad + C, 128) is resident across (b, k):
# rows [0, cx_pad) get the x passthrough at the first step, rows [cx_pad, :)
# accumulate the trilinear sample.  The one-hot is built/consumed in
# 128-sublane-row chunks so the live temp set stays within the vreg file.
# ----------------------------------------------------------------------------
def _sample_concat_kernel(x_ref, bi_ref, row_ref, w0_ref, w1_ref, feat_ref,
                          out_ref, *, cx_pad):
    b = pl.program_id(1)
    k = pl.program_id(2)
    C = feat_ref.shape[1]            # feat block is (1, C, tile_p)
    tp = feat_ref.shape[2]
    tn = x_ref.shape[1]              # node tile (128)

    @pl.when(jnp.logical_and(b == 0, k == 0))
    def _init():
        out_ref[0:cx_pad, :] = x_ref[...]
        out_ref[cx_pad:, :] = jnp.zeros((C, tn), jnp.float32)

    in_b = bi_ref[...] == b                          # (4, tn) batch mask
    w0 = jnp.where(in_b, w0_ref[...], 0.0)
    w1 = jnp.where(in_b, w1_ref[...], 0.0)
    base = row_ref[...] - k * tp                     # tile-local flat indices

    feat = feat_ref[0]                               # (C, tp)
    rows = jax.lax.broadcasted_iota(jnp.int32, (128, tn), 0)

    acc = jnp.zeros((C, tn), jnp.float32)
    for c0 in range(0, tp, 128):                     # 128-row one-hot chunks
        terms = []
        for p in range(4):                           # 4 (batch, y) pairs
            bp = base[p:p + 1, :] - c0
            terms.append(jnp.where(rows == bp, w0[p:p + 1, :], 0.0)
                         + jnp.where(rows == bp + 1, w1[p:p + 1, :], 0.0))
        onehot = (terms[0] + terms[1]) + (terms[2] + terms[3])
        acc = acc + jnp.dot(feat[:, c0:c0 + 128], onehot,
                            preferred_element_type=jnp.float32)
    out_ref[cx_pad:, :] += acc


def sampling_skip_t(x_t, pos, batch, image_feat, width, height,
                    tile_n=128, max_tile_p=256):
    """Channel-major fused sampling_skip.

    x_t: (Cx, N).  Returns (Cx + C, N) = [x ; trilinear_sample(image_feat)].
    """
    B, C, Hf, Wf = map(int, image_feat.shape)
    Cx, N = map(int, x_t.shape)
    HW = Hf * Wf
    cx_pad = _round_up(max(Cx, 1), 8)                # sublane-align the concat

    bi4, row4, w0s, w1s = _corner_data(pos, batch, B, Hf, Wf, width, height)

    tile_p = min(max_tile_p, _round_up(HW, 128))
    n_pad = _round_up(N, tile_n)
    p_pad = _round_up(HW, tile_p)

    x_p = jnp.pad(x_t.astype(jnp.float32), ((0, cx_pad - Cx), (0, n_pad - N)))
    bi4 = jnp.pad(bi4, ((0, 0), (0, n_pad - N)), constant_values=-1)
    row4 = jnp.pad(row4, ((0, 0), (0, n_pad - N)), constant_values=-1)
    w0s = jnp.pad(w0s, ((0, 0), (0, n_pad - N)))
    w1s = jnp.pad(w1s, ((0, 0), (0, n_pad - N)))

    # NCHW -> (B, C, H*W): pure reshape, no HBM transpose pass.
    feat3 = image_feat.astype(jnp.float32).reshape(B, C, HW)
    if p_pad != HW:
        feat3 = jnp.pad(feat3, ((0, 0), (0, 0), (0, p_pad - HW)))

    kernel = functools.partial(_sample_concat_kernel, cx_pad=cx_pad)

    out_t = pl.pallas_call(
        kernel,
        out_shape=jax.ShapeDtypeStruct((cx_pad + C, n_pad), jnp.float32),
        grid_spec=pltpu.PrefetchScalarGridSpec(
            num_scalar_prefetch=0,
            grid=(n_pad // tile_n, B, p_pad // tile_p),
            in_specs=[
                pl.BlockSpec((cx_pad, tile_n), lambda i, b, k: (0, i)),
                pl.BlockSpec((4, tile_n), lambda i, b, k: (0, i)),
                pl.BlockSpec((4, tile_n), lambda i, b, k: (0, i)),
                pl.BlockSpec((4, tile_n), lambda i, b, k: (0, i)),
                pl.BlockSpec((4, tile_n), lambda i, b, k: (0, i)),
                pl.BlockSpec((1, C, tile_p), lambda i, b, k: (b, 0, k)),
            ],
            out_specs=pl.BlockSpec((cx_pad + C, tile_n),
                                   lambda i, b, k: (0, i))),
        compiler_params=pltpu.CompilerParams(
            dimension_semantics=("parallel", "arbitrary", "arbitrary"),
            vmem_limit_bytes=32 * 1024 * 1024),
    )(x_p, bi4, row4, w0s, w1s, feat3)

    if cx_pad == Cx:
        return out_t[:, :N]
    # drop the sublane-alignment padding rows between x and the sampled feats
    return jnp.concatenate([out_t[:Cx], out_t[cx_pad:]], axis=0)[:, :N]


def sampling_skip_pallas(x, pos, batch, image_feat, width, height, **kw):
    """Node-major convenience wrapper: (N, Cx) -> (N, Cx + C)."""
    return sampling_skip_t(x.T, pos, batch, image_feat, width, height, **kw).T


# ----------------------------------------------------------------------------
# Cartesian(norm=True, cat=False, max_value) edge attrs + clamp(0, 1).
# Lane-major layout: input (4, E) = [src_x, src_y, dst_x, dst_y], output (2, E),
# tiled with large lane-dense tiles so the kernel is HBM-bound.
# ----------------------------------------------------------------------------
def _edge_attr_kernel(pts_ref, out_ref, *, inv_scale):
    pts = pts_ref[...]
    cart = (pts[0:2, :] - pts[2:4, :]) * inv_scale + 0.5
    out_ref[...] = jnp.clip(cart, 0.0, 1.0)


def edge_attr_pallas(pos, edge_index, max_value):
    src = pos[edge_index[0], :2]      # gather is glue; elementwise math in-kernel
    dst = pos[edge_index[1], :2]
    E = int(src.shape[0])
    tile_e = min(_round_up(E, 128), 32768)
    e_pad = _round_up(E, tile_e)
    pts = jnp.concatenate([src.T, dst.T], axis=0)          # (4, E)
    pts = jnp.pad(pts.astype(jnp.float32), ((0, 0), (0, e_pad - E)))

    kernel = functools.partial(_edge_attr_kernel,
                               inv_scale=float(1.0 / (2.0 * max_value)))
    out_t = pl.pallas_call(
        kernel,
        out_shape=jax.ShapeDtypeStruct((2, e_pad), jnp.float32),
        grid_spec=pltpu.PrefetchScalarGridSpec(
            num_scalar_prefetch=0,
            grid=(e_pad // tile_e,),
            in_specs=[pl.BlockSpec((4, tile_e), lambda i: (0, i))],
            out_specs=pl.BlockSpec((2, tile_e), lambda i: (0, i))),
        compiler_params=pltpu.CompilerParams(
            dimension_semantics=("parallel",)),
    )(pts)
    return out_t.T[:E]


# ----------------------------------------------------------------------------
# Net (translated portion)
# ----------------------------------------------------------------------------
class Net:
    def __init__(self, args, height, width):
        channels = [1,
                    int(args.base_width * 32),
                    int(args.after_pool_width * 64),
                    int(args.net_stem_width * 128),
                    int(args.net_stem_width * 128),
                    int(args.net_stem_width * 128)]
        self.use_image = args.use_image
        self.num_scales = args.num_scales
        self.num_classes = dict(dsec=2, ncaltech101=100).get(args.dataset, 2)
        self.height, self.width = height, width
        self.out_channels = channels[1:][-2:]
        self.out_channels_cnn = [256, 256] if self.use_image else []
        self.feature_channels = channels[1:]

        poolings = compute_pooling_at_each_layer(args.pooling_dim_at_output,
                                                 num_layers=4)
        self.poolings = poolings
        self.max_vals_for_cartesian = 2 * jnp.max(poolings[:, :2], axis=-1)
        strides = np.ceil(np.asarray(poolings[-2:, 1]) * height).astype('int32').tolist()
        self.strides = strides[-self.num_scales:]
        self.effective_radius = 2 * float(int(args.radius * width + 2) / width)
        # TODO(synk): EV_TGN, Layer (graph conv), Pooling and HookModule(img_net)
        # have no provided source; their stages are not translated.

    def forward(self, data, image_feats):
        x, pos, batch = data['x'], data['pos'], data['batch']
        # TODO(synk): self.events_to_graph(data, reset) not translated.
        x_t = jnp.asarray(x, jnp.float32).T            # channel-major (C, N)
        if self.use_image:
            x_t = sampling_skip_t(x_t, pos, batch, image_feats[0],
                                  self.width, self.height)
        edge_attr = edge_attr_pallas(pos, data['edge_index'],
                                     self.effective_radius)
        rel_delta_t = pos[:, :2].astype(jnp.float32).T
        x_t = jnp.concatenate([x_t, rel_delta_t], axis=0)
        # TODO(synk): conv_block1 / pool1..4 / layer2..5 graph stages not translated.
        if self.use_image:
            x_t = sampling_skip_t(x_t, pos, batch, image_feats[1],
                                  self.width, self.height)
        return x_t.T, edge_attr                        # single transpose at the end


# ----------------------------------------------------------------------------
# reference (numpy) trilinear grid sample for verification
# ----------------------------------------------------------------------------
def grid_sample_ref(pos, batch, feat, width, height):
    B, C, Hf, Wf = feat.shape
    Bs = B if B > 1 else 2
    x = np.asarray(pos[:, 0], dtype=np.float64) * width
    y = np.asarray(pos[:, 1], dtype=np.float64) * height
    b = np.asarray(batch, dtype=np.float64)
    ix = x * (Wf - 1) / (width - 1)
    iy = y * (Hf - 1) / (height - 1)
    ib = b * (B - 1) / (Bs - 1)
    feat = np.asarray(feat, dtype=np.float64)
    N = x.shape[0]
    out = np.zeros((N, C), dtype=np.float64)
    x0 = np.floor(ix).astype(int)
    y0 = np.floor(iy).astype(int)
    b0 = np.floor(ib).astype(int)
    for db in (0, 1):
        wb = (ib - b0) if db else (1.0 - (ib - b0))
        bi = b0 + db
        for dy in (0, 1):
            wy = (iy - y0) if dy else (1.0 - (iy - y0))
            yi = y0 + dy
            for dx in (0, 1):
                wx = (ix - x0) if dx else (1.0 - (ix - x0))
                xi = x0 + dx
                valid = ((xi >= 0) & (xi < Wf) & (yi >= 0) & (yi < Hf)
                         & (bi >= 0) & (bi < B))
                w = wb * wy * wx * valid
                xic = np.clip(xi, 0, Wf - 1)
                yic = np.clip(yi, 0, Hf - 1)
                bic = np.clip(bi, 0, B - 1)
                out += w[:, None] * feat[bic, :, yic, xic]
    return out


if __name__ == "__main__":
    class Args:
        pass

    args = Args()
    args.base_width = 0.5            # -> 16 image-feature channels at layer 0
    args.after_pool_width = 0.5      # -> 32 at layer 1
    args.net_stem_width = 0.25
    args.use_image = True
    args.num_scales = 2
    args.dataset = 'dsec'
    args.pooling_dim_at_output = '4x4'
    args.radius = 0.01
    args.batch_size = 2

    H = W = 16
    N = 200            # not a multiple of the 128-node tile -> exercises padding
    E = 200            # edges
    B = 2              # batch

    key = jax.random.PRNGKey(0)
    k_pos, k_x, k_b, k_e, k_f0, k_f1 = jax.random.split(key, 6)

    pos = jax.random.uniform(k_pos, (N, 3), dtype=jnp.float32)
    x = jax.random.normal(k_x, (N, 1), dtype=jnp.float32)
    batch = jax.random.randint(k_b, (N,), 0, B, dtype=jnp.int32)
    edge_index = jax.random.randint(k_e, (2, E), 0, N, dtype=jnp.int32)
    image_feat0 = jax.random.normal(k_f0, (B, 16, 16, 16), dtype=jnp.float32)  # NCHW
    image_feat1 = jax.random.normal(k_f1, (B, 32, 8, 8), dtype=jnp.float32)    # NCHW

    data = {'x': x, 'pos': pos, 'batch': batch, 'edge_index': edge_index}

    net = Net(args, height=H, width=W)
    out_x, edge_attr = net.forward(data, [image_feat0, image_feat1])
    out_x = jax.block_until_ready(out_x)
    edge_attr = jax.block_until_ready(edge_attr)

    # verify the fused sampling_skip kernel (x passthrough + trilinear sample)
    fused = jax.block_until_ready(
        sampling_skip_pallas(x, pos, batch, image_feat0, W, H))
    ref = grid_sample_ref(pos, batch, image_feat0, W, H)
    np.testing.assert_allclose(np.asarray(fused[:, 1:]), ref, rtol=1e-3, atol=1e-3)
    np.testing.assert_allclose(np.asarray(fused[:, :1]), np.asarray(x),
                               rtol=1e-6, atol=1e-6)

    # verify the edge-attr kernel against plain numpy (PyG Cartesian semantics)
    src = np.asarray(pos[edge_index[0], :2])
    dst = np.asarray(pos[edge_index[1], :2])
    ea_ref = np.clip((src - dst) / (2 * net.effective_radius) + 0.5, 0.0, 1.0)
    np.testing.assert_allclose(np.asarray(edge_attr), ea_ref, rtol=1e-5, atol=1e-5)

    assert out_x.shape == (N, 1 + 16 + 2 + 32)
    assert edge_attr.shape == (E, 2)
    print("KERNEL_OK")
</pallas_src>

<mosaic_0001>
module attributes {stable_mosaic.version = 11 : i64} {
  func.func @_sample_concat_kernel(%arg0: i32, %arg1: i32, %arg2: i32, %arg3: memref<8x128xf32, #tpu.memory_space<vmem>>, %arg4: memref<4x128xi32, #tpu.memory_space<vmem>>, %arg5: memref<4x128xi32, #tpu.memory_space<vmem>>, %arg6: memref<4x128xf32, #tpu.memory_space<vmem>>, %arg7: memref<4x128xf32, #tpu.memory_space<vmem>>, %arg8: memref<1x16x256xf32, #tpu.memory_space<vmem>>, %arg9: memref<24x128xf32, #tpu.memory_space<vmem>>) attributes {dimension_semantics = [#tpu.dimension_semantics<parallel>, #tpu.dimension_semantics<arbitrary>, #tpu.dimension_semantics<arbitrary>], iteration_bounds = array<i64: 2, 2, 1>, scalar_prefetch = 0 : i64, scratch_operands = 0 : i64, tpu.core_type = #tpu.core_type<tc>, window_params = [{transform_indices = @transform_0, window_bounds = array<i64: 8, 128>}, {transform_indices = @transform_1, window_bounds = array<i64: 4, 128>}, {transform_indices = @transform_2, window_bounds = array<i64: 4, 128>}, {transform_indices = @transform_3, window_bounds = array<i64: 4, 128>}, {transform_indices = @transform_4, window_bounds = array<i64: 4, 128>}, {transform_indices = @transform_5, window_bounds = array<i64: 1, 16, 256>}, {transform_indices = @transform_6, window_bounds = array<i64: 24, 128>}]} {
    %c0_i32 = arith.constant 0 : i32
    %0 = arith.cmpi eq, %arg1, %c0_i32 : i32
    %c0_i32_0 = arith.constant 0 : i32
    %1 = arith.cmpi eq, %arg2, %c0_i32_0 : i32
    %2 = arith.andi %0, %1 : i1
    %3 = arith.extui %2 : i1 to i32
    %c0_i32_1 = arith.constant 0 : i32
    %4 = arith.cmpi ne, %3, %c0_i32_1 : i32
    scf.if %4 {
      %c0_49 = arith.constant 0 : index
      %c0_50 = arith.constant 0 : index
      %197 = vector.load %arg3[%c0_49, %c0_50] : memref<8x128xf32, #tpu.memory_space<vmem>>, vector<8x128xf32>
      %c0_51 = arith.constant 0 : index
      %c0_52 = arith.constant 0 : index
      %198 = vector.load %arg9[%c0_51, %c0_52] : memref<24x128xf32, #tpu.memory_space<vmem>>, vector<8x128xf32>
      tpu.vector_store %arg9[%c0_51, %c0_52], %197 {strides = array<i32>} : memref<24x128xf32, #tpu.memory_space<vmem>>, vector<8x128xf32>,
      %cst_53 = arith.constant 0.000000e+00 : f32
      %199 = vector.broadcast %cst_53 : f32 to vector<16x128xf32>
      %c8_54 = arith.constant 8 : index
      %c0_55 = arith.constant 0 : index
      %200 = vector.load %arg9[%c8_54, %c0_55] : memref<24x128xf32, #tpu.memory_space<vmem>>, vector<16x128xf32>
      tpu.vector_store %arg9[%c8_54, %c0_55], %199 {strides = array<i32>} : memref<24x128xf32, #tpu.memory_space<vmem>>, vector<16x128xf32>,
    } else {
    }
    %c0 = arith.constant 0 : index
    %c0_2 = arith.constant 0 : index
    %5 = vector.load %arg4[%c0, %c0_2] : memref<4x128xi32, #tpu.memory_space<vmem>>, vector<4x128xi32>
    %6 = vector.broadcast %arg1 : i32 to vector<4x128xi32>
    %7 = arith.cmpi eq, %5, %6 : vector<4x128xi32>
    %c0_3 = arith.constant 0 : index
    %c0_4 = arith.constant 0 : index
    %8 = vector.load %arg6[%c0_3, %c0_4] : memref<4x128xf32, #tpu.memory_space<vmem>>, vector<4x128xf32>
    %cst = arith.constant 0.000000e+00 : f32
    %9 = vector.broadcast %cst : f32 to vector<4x128xf32>
    %10 = arith.select %7, %8, %9 : vector<4x128xi1>, vector<4x128xf32>
    %c0_5 = arith.constant 0 : index
    %c0_6 = arith.constant 0 : index
    %11 = vector.load %arg7[%c0_5, %c0_6] : memref<4x128xf32, #tpu.memory_space<vmem>>, vector<4x128xf32>
    %cst_7 = arith.constant 0.000000e+00 : f32
    %12 = vector.broadcast %cst_7 : f32 to vector<4x128xf32>
    %13 = arith.select %7, %11, %12 : vector<4x128xi1>, vector<4x128xf32>
    %c0_8 = arith.constant 0 : index
    %c0_9 = arith.constant 0 : index
    %14 = vector.load %arg5[%c0_8, %c0_9] : memref<4x128xi32, #tpu.memory_space<vmem>>, vector<4x128xi32>
    %c256_i32 = arith.constant 256 : i32
    %15 = arith.muli %arg2, %c256_i32 : i32
    %16 = vector.broadcast %15 : i32 to vector<4x128xi32>
    %17 = arith.subi %14, %16 : vector<4x128xi32>
    %c0_10 = arith.constant 0 : index
    %c0_11 = arith.constant 0 : index
    %c0_12 = arith.constant 0 : index
    %18 = vector.load %arg8[%c0_10, %c0_11, %c0_12] : memref<1x16x256xf32, #tpu.memory_space<vmem>>, vector<1x16x256xf32>
    %19 = vector.shape_cast %18 : vector<1x16x256xf32> to vector<16x256xf32>
    %20 = tpu.iota {dimensions = array<i32: 0>} : vector<128x128xi32>
    %cst_13 = arith.constant 0.000000e+00 : f32
    %21 = vector.broadcast %cst_13 : f32 to vector<16x128xf32>
    %22 = vector.extract_strided_slice %17 {offsets = [0, 0], sizes = [1, 128], strides = [1, 1]} : vector<4x128xi32> to vector<1x128xi32>
    %c0_i32_14 = arith.constant 0 : i32
    %23 = vector.broadcast %c0_i32_14 : i32 to vector<1x128xi32>
    %24 = arith.subi %22, %23 : vector<1x128xi32>
    %25 = vector.broadcast %24 : vector<1x128xi32> to vector<128x128xi32>
    %26 = arith.cmpi eq, %20, %25 : vector<128x128xi32>
    %27 = vector.extract_strided_slice %10 {offsets = [0, 0], sizes = [1, 128], strides = [1, 1]} : vector<4x128xf32> to vector<1x128xf32>
    %cst_15 = arith.constant 0.000000e+00 : f32
    %28 = vector.shape_cast %27 : vector<1x128xf32> to vector<1x128xf32>
    %29 = vector.broadcast %28 : vector<1x128xf32> to vector<128x128xf32>
    %30 = vector.broadcast %cst_15 : f32 to vector<128x128xf32>
    %31 = arith.select %26, %29, %30 : vector<128x128xi1>, vector<128x128xf32>
    %c1_i32 = arith.constant 1 : i32
    %32 = vector.broadcast %c1_i32 : i32 to vector<1x128xi32>
    %33 = arith.addi %24, %32 : vector<1x128xi32>
    %34 = vector.broadcast %33 : vector<1x128xi32> to vector<128x128xi32>
    %35 = arith.cmpi eq, %20, %34 : vector<128x128xi32>
    %36 = vector.extract_strided_slice %13 {offsets = [0, 0], sizes = [1, 128], strides = [1, 1]} : vector<4x128xf32> to vector<1x128xf32>
    %cst_16 = arith.constant 0.000000e+00 : f32
    %37 = vector.shape_cast %36 : vector<1x128xf32> to vector<1x128xf32>
    %38 = vector.broadcast %37 : vector<1x128xf32> to vector<128x128xf32>
    %39 = vector.broadcast %cst_16 : f32 to vector<128x128xf32>
    %40 = arith.select %35, %38, %39 : vector<128x128xi1>, vector<128x128xf32>
    %41 = arith.addf %31, %40 : vector<128x128xf32>
    %42 = vector.extract_strided_slice %17 {offsets = [1, 0], sizes = [1, 128], strides = [1, 1]} : vector<4x128xi32> to vector<1x128xi32>
    %c0_i32_17 = arith.constant 0 : i32
    %43 = vector.broadcast %c0_i32_17 : i32 to vector<1x128xi32>
    %44 = arith.subi %42, %43 : vector<1x128xi32>
    %45 = vector.broadcast %44 : vector<1x128xi32> to vector<128x128xi32>
    %46 = arith.cmpi eq, %20, %45 : vector<128x128xi32>
    %47 = vector.extract_strided_slice %10 {offsets = [1, 0], sizes = [1, 128], strides = [1, 1]} : vector<4x128xf32> to vector<1x128xf32>
    %cst_18 = arith.constant 0.000000e+00 : f32
    %48 = vector.shape_cast %47 : vector<1x128xf32> to vector<1x128xf32>
    %49 = vector.broadcast %48 : vector<1x128xf32> to vector<128x128xf32>
    %50 = vector.broadcast %cst_18 : f32 to vector<128x128xf32>
    %51 = arith.select %46, %49, %50 : vector<128x128xi1>, vector<128x128xf32>
    %c1_i32_19 = arith.constant 1 : i32
    %52 = vector.broadcast %c1_i32_19 : i32 to vector<1x128xi32>
    %53 = arith.addi %44, %52 : vector<1x128xi32>
    %54 = vector.broadcast %53 : vector<1x128xi32> to vector<128x128xi32>
    %55 = arith.cmpi eq, %20, %54 : vector<128x128xi32>
    %56 = vector.extract_strided_slice %13 {offsets = [1, 0], sizes = [1, 128], strides = [1, 1]} : vector<4x128xf32> to vector<1x128xf32>
    %cst_20 = arith.constant 0.000000e+00 : f32
    %57 = vector.shape_cast %56 : vector<1x128xf32> to vector<1x128xf32>
    %58 = vector.broadcast %57 : vector<1x128xf32> to vector<128x128xf32>
    %59 = vector.broadcast %cst_20 : f32 to vector<128x128xf32>
    %60 = arith.select %55, %58, %59 : vector<128x128xi1>, vector<128x128xf32>
    %61 = arith.addf %51, %60 : vector<128x128xf32>
    %62 = vector.extract_strided_slice %17 {offsets = [2, 0], sizes = [1, 128], strides = [1, 1]} : vector<4x128xi32> to vector<1x128xi32>
    %c0_i32_21 = arith.constant 0 : i32
    %63 = vector.broadcast %c0_i32_21 : i32 to vector<1x128xi32>
    %64 = arith.subi %62, %63 : vector<1x128xi32>
    %65 = vector.broadcast %64 : vector<1x128xi32> to vector<128x128xi32>
    %66 = arith.cmpi eq, %20, %65 : vector<128x128xi32>
    %67 = vector.extract_strided_slice %10 {offsets = [2, 0], sizes = [1, 128], strides = [1, 1]} : vector<4x128xf32> to vector<1x128xf32>
    %cst_22 = arith.constant 0.000000e+00 : f32
    %68 = vector.shape_cast %67 : vector<1x128xf32> to vector<1x128xf32>
    %69 = vector.broadcast %68 : vector<1x128xf32> to vector<128x128xf32>
    %70 = vector.broadcast %cst_22 : f32 to vector<128x128xf32>
    %71 = arith.select %66, %69, %70 : vector<128x128xi1>, vector<128x128xf32>
    %c1_i32_23 = arith.constant 1 : i32
    %72 = vector.broadcast %c1_i32_23 : i32 to vector<1x128xi32>
    %73 = arith.addi %64, %72 : vector<1x128xi32>
    %74 = vector.broadcast %73 : vector<1x128xi32> to vector<128x128xi32>
    %75 = arith.cmpi eq, %20, %74 : vector<128x128xi32>
    %76 = vector.extract_strided_slice %13 {offsets = [2, 0], sizes = [1, 128], strides = [1, 1]} : vector<4x128xf32> to vector<1x128xf32>
    %cst_24 = arith.constant 0.000000e+00 : f32
    %77 = vector.shape_cast %76 : vector<1x128xf32> to vector<1x128xf32>
    %78 = vector.broadcast %77 : vector<1x128xf32> to vector<128x128xf32>
    %79 = vector.broadcast %cst_24 : f32 to vector<128x128xf32>
    %80 = arith.select %75, %78, %79 : vector<128x128xi1>, vector<128x128xf32>
    %81 = arith.addf %71, %80 : vector<128x128xf32>
    %82 = vector.extract_strided_slice %17 {offsets = [3, 0], sizes = [1, 128], strides = [1, 1]} : vector<4x128xi32> to vector<1x128xi32>
    %c0_i32_25 = arith.constant 0 : i32
    %83 = vector.broadcast %c0_i32_25 : i32 to vector<1x128xi32>
    %84 = arith.subi %82, %83 : vector<1x128xi32>
    %85 = vector.broadcast %84 : vector<1x128xi32> to vector<128x128xi32>
    %86 = arith.cmpi eq, %20, %85 : vector<128x128xi32>
    %87 = vector.extract_strided_slice %10 {offsets = [3, 0], sizes = [1, 128], strides = [1, 1]} : vector<4x128xf32> to vector<1x128xf32>
    %cst_26 = arith.constant 0.000000e+00 : f32
    %88 = vector.shape_cast %87 : vector<1x128xf32> to vector<1x128xf32>
    %89 = vector.broadcast %88 : vector<1x128xf32> to vector<128x128xf32>
    %90 = vector.broadcast %cst_26 : f32 to vector<128x128xf32>
    %91 = arith.select %86, %89, %90 : vector<128x128xi1>, vector<128x128xf32>
    %c1_i32_27 = arith.constant 1 : i32
    %92 = vector.broadcast %c1_i32_27 : i32 to vector<1x128xi32>
    %93 = arith.addi %84, %92 : vector<1x128xi32>
    %94 = vector.broadcast %93 : vector<1x128xi32> to vector<128x128xi32>
    %95 = arith.cmpi eq, %20, %94 : vector<128x128xi32>
    %96 = vector.extract_strided_slice %13 {offsets = [3, 0], sizes = [1, 128], strides = [1, 1]} : vector<4x128xf32> to vector<1x128xf32>
    %cst_28 = arith.constant 0.000000e+00 : f32
    %97 = vector.shape_cast %96 : vector<1x128xf32> to vector<1x128xf32>
    %98 = vector.broadcast %97 : vector<1x128xf32> to vector<128x128xf32>
    %99 = vector.broadcast %cst_28 : f32 to vector<128x128xf32>
    %100 = arith.select %95, %98, %99 : vector<128x128xi1>, vector<128x128xf32>
    %101 = arith.addf %91, %100 : vector<128x128xf32>
    %102 = arith.addf %41, %61 : vector<128x128xf32>
    %103 = arith.addf %81, %101 : vector<128x128xf32>
    %104 = arith.addf %102, %103 : vector<128x128xf32>
    %105 = vector.extract_strided_slice %19 {offsets = [0, 0], sizes = [16, 128], strides = [1, 1]} : vector<16x256xf32> to vector<16x128xf32>
    %cst_29 = arith.constant dense<0.000000e+00> : vector<16x128xf32>
    %106 = tpu.matmul %105, %104, %cst_29 {dimension_numbers = #tpu.dot_dimension_numbers<[1], [0], [0], [1], [0, 0, 1, 1], [], []>} : vector<16x128xf32>, vector<128x128xf32>, vector<16x128xf32> -> vector<16x128xf32>
    %107 = arith.addf %21, %106 : vector<16x128xf32>
    %108 = vector.extract_strided_slice %17 {offsets = [0, 0], sizes = [1, 128], strides = [1, 1]} : vector<4x128xi32> to vector<1x128xi32>
    %c128_i32 = arith.constant 128 : i32
    %109 = vector.broadcast %c128_i32 : i32 to vector<1x128xi32>
    %110 = arith.subi %108, %109 : vector<1x128xi32>
    %111 = vector.broadcast %110 : vector<1x128xi32> to vector<128x128xi32>
    %112 = arith.cmpi eq, %20, %111 : vector<128x128xi32>
    %113 = vector.extract_strided_slice %10 {offsets = [0, 0], sizes = [1, 128], strides = [1, 1]} : vector<4x128xf32> to vector<1x128xf32>
    %cst_30 = arith.constant 0.000000e+00 : f32
    %114 = vector.shape_cast %113 : vector<1x128xf32> to vector<1x128xf32>
    %115 = vector.broadcast %114 : vector<1x128xf32> to vector<128x128xf32>
    %116 = vector.broadcast %cst_30 : f32 to vector<128x128xf32>
    %117 = arith.select %112, %115, %116 : vector<128x128xi1>, vector<128x128xf32>
    %c1_i32_31 = arith.constant 1 : i32
    %118 = vector.broadcast %c1_i32_31 : i32 to vector<1x128xi32>
    %119 = arith.addi %110, %118 : vector<1x128xi32>
    %120 = vector.broadcast %119 : vector<1x128xi32> to vector<128x128xi32>
    %121 = arith.cmpi eq, %20, %120 : vector<128x128xi32>
    %122 = vector.extract_strided_slice %13 {offsets = [0, 0], sizes = [1, 128], strides = [1, 1]} : vector<4x128xf32> to vector<1x128xf32>
    %cst_32 = arith.constant 0.000000e+00 : f32
    %123 = vector.shape_cast %122 : vector<1x128xf32> to vector<1x128xf32>
    %124 = vector.broadcast %123 : vector<1x128xf32> to vector<128x128xf32>
    %125 = vector.broadcast %cst_32 : f32 to vector<128x128xf32>
    %126 = arith.select %121, %124, %125 : vector<128x128xi1>, vector<128x128xf32>
    %127 = arith.addf %117, %126 : vector<128x128xf32>
    %128 = vector.extract_strided_slice %17 {offsets = [1, 0], sizes = [1, 128], strides = [1, 1]} : vector<4x128xi32> to vector<1x128xi32>
    %c128_i32_33 = arith.constant 128 : i32
    %129 = vector.broadcast %c128_i32_33 : i32 to vector<1x128xi32>
    %130 = arith.subi %128, %129 : vector<1x128xi32>
    %131 = vector.broadcast %130 : vector<1x128xi32> to vector<128x128xi32>
    %132 = arith.cmpi eq, %20, %131 : vector<128x128xi32>
    %133 = vector.extract_strided_slice %10 {offsets = [1, 0], sizes = [1, 128], strides = [1, 1]} : vector<4x128xf32> to vector<1x128xf32>
    %cst_34 = arith.constant 0.000000e+00 : f32
    %134 = vector.shape_cast %133 : vector<1x128xf32> to vector<1x128xf32>
    %135 = vector.broadcast %134 : vector<1x128xf32> to vector<128x128xf32>
    %136 = vector.broadcast %cst_34 : f32 to vector<128x128xf32>
    %137 = arith.select %132, %135, %136 : vector<128x128xi1>, vector<128x128xf32>
    %c1_i32_35 = arith.constant 1 : i32
    %138 = vector.broadcast %c1_i32_35 : i32 to vector<1x128xi32>
    %139 = arith.addi %130, %138 : vector<1x128xi32>
    %140 = vector.broadcast %139 : vector<1x128xi32> to vector<128x128xi32>
    %141 = arith.cmpi eq, %20, %140 : vector<128x128xi32>
    %142 = vector.extract_strided_slice %13 {offsets = [1, 0], sizes = [1, 128], strides = [1, 1]} : vector<4x128xf32> to vector<1x128xf32>
    %cst_36 = arith.constant 0.000000e+00 : f32
    %143 = vector.shape_cast %142 : vector<1x128xf32> to vector<1x128xf32>
    %144 = vector.broadcast %143 : vector<1x128xf32> to vector<128x128xf32>
    %145 = vector.broadcast %cst_36 : f32 to vector<128x128xf32>
    %146 = arith.select %141, %144, %145 : vector<128x128xi1>, vector<128x128xf32>
    %147 = arith.addf %137, %146 : vector<128x128xf32>
    %148 = vector.extract_strided_slice %17 {offsets = [2, 0], sizes = [1, 128], strides = [1, 1]} : vector<4x128xi32> to vector<1x128xi32>
    %c128_i32_37 = arith.constant 128 : i32
    %149 = vector.broadcast %c128_i32_37 : i32 to vector<1x128xi32>
    %150 = arith.subi %148, %149 : vector<1x128xi32>
    %151 = vector.broadcast %150 : vector<1x128xi32> to vector<128x128xi32>
    %152 = arith.cmpi eq, %20, %151 : vector<128x128xi32>
    %153 = vector.extract_strided_slice %10 {offsets = [2, 0], sizes = [1, 128], strides = [1, 1]} : vector<4x128xf32> to vector<1x128xf32>
    %cst_38 = arith.constant 0.000000e+00 : f32
    %154 = vector.shape_cast %153 : vector<1x128xf32> to vector<1x128xf32>
    %155 = vector.broadcast %154 : vector<1x128xf32> to vector<128x128xf32>
    %156 = vector.broadcast %cst_38 : f32 to vector<128x128xf32>
    %157 = arith.select %152, %155, %156 : vector<128x128xi1>, vector<128x128xf32>
    %c1_i32_39 = arith.constant 1 : i32
    %158 = vector.broadcast %c1_i32_39 : i32 to vector<1x128xi32>
    %159 = arith.addi %150, %158 : vector<1x128xi32>
    %160 = vector.broadcast %159 : vector<1x128xi32> to vector<128x128xi32>
    %161 = arith.cmpi eq, %20, %160 : vector<128x128xi32>
    %162 = vector.extract_strided_slice %13 {offsets = [2, 0], sizes = [1, 128], strides = [1, 1]} : vector<4x128xf32> to vector<1x128xf32>
    %cst_40 = arith.constant 0.000000e+00 : f32
    %163 = vector.shape_cast %162 : vector<1x128xf32> to vector<1x128xf32>
    %164 = vector.broadcast %163 : vector<1x128xf32> to vector<128x128xf32>
    %165 = vector.broadcast %cst_40 : f32 to vector<128x128xf32>
    %166 = arith.select %161, %164, %165 : vector<128x128xi1>, vector<128x128xf32>
    %167 = arith.addf %157, %166 : vector<128x128xf32>
    %168 = vector.extract_strided_slice %17 {offsets = [3, 0], sizes = [1, 128], strides = [1, 1]} : vector<4x128xi32> to vector<1x128xi32>
    %c128_i32_41 = arith.constant 128 : i32
    %169 = vector.broadcast %c128_i32_41 : i32 to vector<1x128xi32>
    %170 = arith.subi %168, %169 : vector<1x128xi32>
    %171 = vector.broadcast %170 : vector<1x128xi32> to vector<128x128xi32>
    %172 = arith.cmpi eq, %20, %171 : vector<128x128xi32>
    %173 = vector.extract_strided_slice %10 {offsets = [3, 0], sizes = [1, 128], strides = [1, 1]} : vector<4x128xf32> to vector<1x128xf32>
    %cst_42 = arith.constant 0.000000e+00 : f32
    %174 = vector.shape_cast %173 : vector<1x128xf32> to vector<1x128xf32>
    %175 = vector.broadcast %174 : vector<1x128xf32> to vector<128x128xf32>
    %176 = vector.broadcast %cst_42 : f32 to vector<128x128xf32>
    %177 = arith.select %172, %175, %176 : vector<128x128xi1>, vector<128x128xf32>
    %c1_i32_43 = arith.constant 1 : i32
    %178 = vector.broadcast %c1_i32_43 : i32 to vector<1x128xi32>
    %179 = arith.addi %170, %178 : vector<1x128xi32>
    %180 = vector.broadcast %179 : vector<1x128xi32> to vector<128x128xi32>
    %181 = arith.cmpi eq, %20, %180 : vector<128x128xi32>
    %182 = vector.extract_strided_slice %13 {offsets = [3, 0], sizes = [1, 128], strides = [1, 1]} : vector<4x128xf32> to vector<1x128xf32>
    %cst_44 = arith.constant 0.000000e+00 : f32
    %183 = vector.shape_cast %182 : vector<1x128xf32> to vector<1x128xf32>
    %184 = vector.broadcast %183 : vector<1x128xf32> to vector<128x128xf32>
    %185 = vector.broadcast %cst_44 : f32 to vector<128x128xf32>
    %186 = arith.select %181, %184, %185 : vector<128x128xi1>, vector<128x128xf32>
    %187 = arith.addf %177, %186 : vector<128x128xf32>
    %188 = arith.addf %127, %147 : vector<128x128xf32>
    %189 = arith.addf %167, %187 : vector<128x128xf32>
    %190 = arith.addf %188, %189 : vector<128x128xf32>
    %191 = vector.extract_strided_slice %19 {offsets = [0, 128], sizes = [16, 128], strides = [1, 1]} : vector<16x256xf32> to vector<16x128xf32>
    %cst_45 = arith.constant dense<0.000000e+00> : vector<16x128xf32>
    %192 = tpu.matmul %191, %190, %cst_45 {dimension_numbers = #tpu.dot_dimension_numbers<[1], [0], [0], [1], [0, 0, 1, 1], [], []>} : vector<16x128xf32>, vector<128x128xf32>, vector<16x128xf32> -> vector<16x128xf32>
    %193 = arith.addf %107, %192 : vector<16x128xf32>
    %c8 = arith.constant 8 : index
    %c0_46 = arith.constant 0 : index
    %194 = vector.load %arg9[%c8, %c0_46] : memref<24x128xf32, #tpu.memory_space<vmem>>, vector<16x128xf32>
    %195 = arith.addf %194, %193 : vector<16x128xf32>
    %c8_47 = arith.constant 8 : index
    %c0_48 = arith.constant 0 : index
    %196 = vector.load %arg9[%c8_47, %c0_48] : memref<24x128xf32, #tpu.memory_space<vmem>>, vector<16x128xf32>
    tpu.vector_store %arg9[%c8_47, %c0_48], %195 {strides = array<i32>} : memref<24x128xf32, #tpu.memory_space<vmem>>, vector<16x128xf32>,
    return
  }
  func.func @transform_0(%arg0: i32, %arg1: i32, %arg2: i32) -> (i32, i32) {
    %c0_i32 = arith.constant 0 : i32
    %c0_i32_0 = arith.constant 0 : i32
    return %c0_i32, %arg0 : i32, i32
  }
  func.func @transform_1(%arg0: i32, %arg1: i32, %arg2: i32) -> (i32, i32) {
    %c0_i32 = arith.constant 0 : i32
    %c0_i32_0 = arith.constant 0 : i32
    return %c0_i32, %arg0 : i32, i32
  }
  func.func @transform_2(%arg0: i32, %arg1: i32, %arg2: i32) -> (i32, i32) {
    %c0_i32 = arith.constant 0 : i32
    %c0_i32_0 = arith.constant 0 : i32
    return %c0_i32, %arg0 : i32, i32
  }
  func.func @transform_3(%arg0: i32, %arg1: i32, %arg2: i32) -> (i32, i32) {
    %c0_i32 = arith.constant 0 : i32
    %c0_i32_0 = arith.constant 0 : i32
    return %c0_i32, %arg0 : i32, i32
  }
  func.func @transform_4(%arg0: i32, %arg1: i32, %arg2: i32) -> (i32, i32) {
    %c0_i32 = arith.constant 0 : i32
    %c0_i32_0 = arith.constant 0 : i32
    return %c0_i32, %arg0 : i32, i32
  }
  func.func @transform_5(%arg0: i32, %arg1: i32, %arg2: i32) -> (i32, i32, i32) {
    %c0_i32 = arith.constant 0 : i32
    %c0_i32_0 = arith.constant 0 : i32
    return %arg1, %c0_i32, %arg2 : i32, i32, i32
  }
  func.func @transform_6(%arg0: i32, %arg1: i32, %arg2: i32) -> (i32, i32) {
    %c0_i32 = arith.constant 0 : i32
    %c0_i32_0 = arith.constant 0 : i32
    return %c0_i32, %arg0 : i32, i32
  }
}

</mosaic_0001>

<bundles_post_ra>
// kernel: tpu_custom_call.1
= control target key start
LH: loop header
LB: loop body
LE: loop exit
PB: predicated region body
PF: predicated region fallthrough
CT: control target
= control target key end

     0   :  { %s3187_s0 = inlined_call_operand.hbm [shape: f32[8,256], index: 0, kind: input, shape index: {}]   ;;  %s3188_s1 = inlined_call_operand.hbm [shape: s32[4,256], index: 1, kind: input, shape index: {}]   ;;  %s3189_s2 = inlined_call_operand.hbm [shape: s32[4,256], index: 2, kind: input, shape index: {}]   ;;  %s3190_s3 = inlined_call_operand.hbm [shape: f32[4,256], index: 3, kind: input, shape index: {}]   ;;  %s3191_s4 = inlined_call_operand.hbm [shape: f32[4,256], index: 4, kind: input, shape index: {}]   ;;  %s3192_s5 = inlined_call_operand.hbm [shape: f32[2,16,256], index: 5, kind: input, shape index: {}]   ;;  %s3193_s6 = inlined_call_operand.hbm [shape: f32[24,256], index: 6, kind: output, shape index: {}]  }
   0x1   :  { %3203 = sst [smem:[#allocation27_spill]] %s3188_s1 }
   0x2   :  { %3204 = sst [smem:[#allocation28_spill]] %s3190_s3 }
   0x3   :  { %3205 = sst [smem:[#allocation29_spill]] %s3193_s6 }
   0x4   :  { %11 = vsyncpa [#allocation3], 0 }
   0x5   :  { %13 = vsyncpa [#allocation3 + $0x1], 0 }
   0x6   :  { %14 = vsyncpa [#allocation6], 0 }
   0x7   :  { %16 = vsyncpa [#allocation6 + $0x1], 0 }
   0x8   :  { %17 = vsyncpa [#allocation9], 0 }
   0x9   :  { %19 = vsyncpa [#allocation9 + $0x1], 0 }
   0xa   :  { %20 = vsyncpa [#allocation12], 0 }
   0xb   :  { %22 = vsyncpa [#allocation12 + $0x1], 0 }
   0xc   :  { %23 = vsyncpa [#allocation4], 0 }
   0xd   :  { %25 = vsyncpa [#allocation4 + $0x1], 0  ;;  %s2110_s21 = smov 0   ;;  %s2112_s22 = smov 0  }
   0xe   :  { %s2114_s23 = smov 0   ;;  %s2116_s24 = smov 0  }
   0xf   :  { %s2118_s25 = smov 0   ;;  %s2120_s26 = smov 0  }
  0x10   :  { %s2122_s27 = smov 0   ;;  %s2124_s28 = smov 0  }
  0x11   :  { %s2126_s29 = smov 0   ;;  %s2128_s30 = smov 0  }
  0x12   :  { %s2130_s7 = smov 0  }
  0x13 LB: > { %3206 = sst [smem:[#allocation19_spill]] %s2039_s24  ;;  %s2166_s8 = sadd.s32 4294967295, %s2067_s7   ;;  %s2067_s7 = sphi %s2130_s7, %s31_s7   ;;  %s2063_s30 = sphi %s2128_s30, %s3246_s30   ;;  %s2059_s29 = sphi %s2126_s29, %s3245_s29   ;;  %s2055_s28 = sphi %s2124_s28, %s3244_s28   ;;  %s2051_s27 = sphi %s2122_s27, %s3243_s27   ;;  %s2047_s26 = sphi %s2120_s26, %s3242_s26   ;;  %s2043_s25 = sphi %s2118_s25, %s3241_s25   ;;  %s2039_s24 = sphi %s2116_s24, %s3236_s24   ;;  %s2035_s23 = sphi %s2114_s23, %s3240_s23   ;;  %s2031_s22 = sphi %s2112_s22, %s3239_s22   ;;  %s2027_s21 = sphi %s2110_s21, %s3238_s21  }
  0x14   : > { %3207 = sst [smem:[#allocation20_spill]] %s2043_s25  ;;  %s1557_s9 = sadd.s32 4294967294, %s2067_s7  }
  0x15   : > { %3208 = sst [smem:[#allocation21_spill]] %s2051_s27  ;;  %p64_p0 = scmp.ne.s32.totalorder %s2047_s26, %s2043_s25 }
  0x16   : > { %3209 = sst [smem:[#allocation22_spill]] %s2055_s28  ;;  %p65_p1 = scmp.eq.s32.totalorder %s2067_s7, 0 }
  0x17   : > { %p70_p2 = scmp.ne.s32.totalorder %s2043_s25, %s2039_s24  ;;  %p71_p3 = scmp.eq.s32.totalorder %s2166_s8, 0 }
  0x18   : > { %p66_p4 = por %p65_p1, %p64_p0  ;;  %p226_p5 = scmp.eq.s32.totalorder %s2166_s8, 3 }
  0x19   : > { %p2182_p6 = por %p71_p3, %p70_p2  ;;  %p232_p7 = scmp.eq.s32.totalorder %s1557_s9, 3 }
  0x1a   : > { %p2186_p8 = por %p226_p5, %p64_p0  ;;  %p1657_p10 = scmp.lt.s32.totalorder %s2067_s7, 4 }
  0x1b   : > { %s3210_s12 = scalar_select %p2182_p6, 1, 0 }
  0x1c   : > { %s3212_s13 = scalar_select %p2186_p8, 1, 0 }
  0x1d   : > { %3211 = sst [smem:[#allocation23_spill]] %s3210_s12  ;;  %p2190_p9 = por %p232_p7, %p70_p2 }
  0x1e   : > { %3213 = sst [smem:[#allocation24_spill]] %s3212_s13  ;;  %s2196_s15 = sand.u32 1, %s2047_s26  }
  0x1f   : > { %s3214_s14 = scalar_select %p2190_p9, 1, 0 }
  0x20   : > { %s271_s16 = sand.u32 1, %s2067_s7   ;;  %p2201_p11 = pnand %p1657_p10, %p66_p4 }
  0x21   : > { %3215 = sst [smem:[#allocation25_spill]] %s3214_s14  ;;  %s2206_s18 = sshll.u32 %s2196_s15, 2 }
  0x22   : > { %s2209_s19 = sshll.u32 %s2063_s30, 2  ;;  %s3217_s1 = sld [smem:[#allocation27_spill]] }
  0x23   : > { %s275_s10 = scalar_lea.vmem [#allocation5], %s2206_s18  ;;  %p1573_p12 = scmp.ge.s32.totalorder %s2067_s7, 1 }
  0x24   : > { %s283_s14 = sshll.u32 %s275_s10, 4  ;;  %s2217_s13 = scalar_lea.sflag [#allocation6], %s271_s16  ;;  %s284_s14 = int_to_ptr.vmem [resolvable:$true] %s283_s14 }
  0x25   : > { %p369_p13 = scmp.lt.s32.totalorder %s2067_s7, 5  ;;  %s3218_s3 = sld [smem:[#allocation28_spill]] }
  0x26   : > { %s310_s27 = scalar_lea.sflag [#allocation9], %s271_s16  ;;  %s1561_s6 = sshll.u32 %s2063_s30, 3 }
  0x27   : > { %p2227_p0 = pnand %p1573_p12, %p369_p13  ;;  %s332_s28 = scalar_lea.vmem [#allocation10], %s2206_s18 }
  0x28   : > { %s279_s11 = scalar_lea.hbm %s3217_s1, %s2209_s19  ;;  %p196_p4 = scmp.ne.s32.totalorder %s2035_s23, %s2031_s22 }
  0x29   : > { %s281_s24 = sshll.u32 %s279_s11, 4  ;;  %s313_s11 = scalar_lea.vmem [#allocation8], %s2206_s18  ;;  %s282_s24 = int_to_ptr.hbm [resolvable:$true] %s281_s24 }
  0x2a   : > { %1640 = dma.hbm_to_vmem [thread:$0]  (!%p2201_p11), %s282_s24, 64, %s284_s14, %s2217_s13  }
  0x2b   : > { %s317_s20 = scalar_lea.hbm %s3218_s3, %s2209_s19  ;;  %s321_s1 = sshll.u32 %s313_s11, 4  ;;  %s322_s1 = int_to_ptr.vmem [resolvable:$true] %s321_s1 }
  0x2c   : > { %s3219_s9 = scalar_select %p2227_p0, 1, 0 }
  0x2d   : > { %s319_s10 = sshll.u32 %s317_s20, 4  ;;  %s1560_s24 = sshll.u32 %s2196_s15, 3  ;;  %s320_s10 = int_to_ptr.hbm [resolvable:$true] %s319_s10 }
  0x2e   : > { %3220 = sst [smem:[#allocation26_spill]] %s3219_s9  ;;  %s260_s3 = scalar_lea.hbm %s3187_s0, %s1561_s6 }
  0x2f   : > { %1646 = dma.hbm_to_vmem [thread:$0]  (!%p2201_p11), %s320_s10, 64, %s322_s1, %s310_s27  }
  0x30   : > { %s262_s20 = sshll.u32 %s260_s3, 4  ;;  %s256_s12 = scalar_lea.vmem [#allocation2], %s1560_s24  ;;  %s263_s20 = int_to_ptr.hbm [resolvable:$true] %s262_s20 }
  0x31   : > { %s264_s25 = sshll.u32 %s256_s12, 4  ;;  %s253_s11 = scalar_lea.sflag [#allocation3], %s2196_s15  ;;  %s265_s25 = int_to_ptr.vmem [resolvable:$true] %s264_s25 }
  0x32   : > { %1637 = dma.hbm_to_vmem [thread:$0]  (!%p2201_p11), %s263_s20, 128, %s265_s25, %s253_s11  }
  0x33   : > { %s298_s10 = scalar_lea.hbm %s3189_s2, %s2209_s19  ;;  %s294_s6 = scalar_lea.vmem [#allocation7], %s2206_s18 }
  0x34   : > { %s300_s9 = sshll.u32 %s298_s10, 4  ;;  %s302_s3 = sshll.u32 %s294_s6, 4  ;;  %s301_s9 = int_to_ptr.hbm [resolvable:$true] %s300_s9  ;;  %s303_s3 = int_to_ptr.vmem [resolvable:$true] %s302_s3 }
  0x35   : > { %1643 = dma.hbm_to_vmem [thread:$0]  (!%p2201_p11), %s301_s9, 64, %s303_s3, %s2217_s13  }
  0x36   : > { %s336_s15 = scalar_lea.hbm %s3191_s4, %s2209_s19  ;;  %s340_s14 = sshll.u32 %s332_s28, 4  ;;  %s341_s14 = int_to_ptr.vmem [resolvable:$true] %s340_s14 }
  0x37   : > { %s338_s24 = sshll.u32 %s336_s15, 4  ;;  %s46_s20 = sadd.s32 1, %s2059_s29  ;;  %s339_s24 = int_to_ptr.hbm [resolvable:$true] %s338_s24 }
  0x38   : > { %1649 = dma.hbm_to_vmem [thread:$0]  (!%p2201_p11), %s339_s24, 64, %s341_s14, %s310_s27  }
  0x39   : > { %s189_s11 = sadd.s32 1, %s2035_s23  ;;  %p48_p2 = scmp.ge.s32.totalorder %s46_s20, 2 }
  0x3a   : > { %p202_p5 = scmp.ne.s32.totalorder %s2031_s22, %s2027_s21  ;;  %s347_s13 = sand.u32 1, %s2035_s23  }
  0x3b   : > { %s3248_s20 = smov (%p48_p2, %s46_s20), 0  ;;  %s3221_s18 = sadd.s32 1, %s2063_s30 }
  0x3c   : > { %s3250_s18 = smov (!%p48_p2, %s3221_s18), %s2063_s30  ;;  %s184_s19 = ssub.s32 %s2059_s29, %s3248_s20 }
  0x3d   : > { %p2273_p7 = por %p196_p4, %p65_p1  ;;  %p52_p11 = scmp.ge.s32.totalorder %s3250_s18, 2 }
  0x3e   : > { %p187_p12 = scmp.eq.s32.totalorder %s184_s19, 0  ;;  %p2279_p13 = por %p202_p5, %p71_p3 }
  0x3f   : > { %s3252_s18 = smov (%p52_p11, %s3250_s18), 0  ;;  %s1570_s1 = sshll.u32 %s347_s13, 5 }
  0x40   : > { %s2286_s27 = scalar_select %p187_p12, %s2035_s23, %s189_s11  }
  0x41   : > { %s54_s9 = ssub.s32 %s2063_s30, %s3252_s18  ;;  %s1585_s16 = sshll.u32 %s2059_s29, 5 }
  0x42   : > { %p55_p1 = scmp.eq.s32.totalorder %s54_s9, 0  ;;  %s351_s10 = scalar_lea.vmem [#allocation11], %s1570_s1 }
  0x43   : > { %s361_s6 = sshll.u32 %s351_s10, 4  ;;  %s3224_s3 = sadd.s32 1, %s2047_s26  ;;  %s362_s6 = int_to_ptr.vmem [resolvable:$true] %s361_s6 }
  0x44   : > { %s2294_s25 = scalar_select %p55_p1, %s2047_s26, %s3224_s3  }
  0x45   : > { %s358_s24 = scalar_lea.hbm %s3192_s5, %s1585_s16  ;;  %p1650_p3 = pnand %p1657_p10, %p2273_p7 }
  0x46   : > { %s359_s28 = sshll.u32 %s358_s24, 4  ;;  %s348_s14 = scalar_lea.sflag [#allocation12], %s347_s13  ;;  %s360_s28 = int_to_ptr.hbm [resolvable:$true] %s359_s28 }
  0x47   : > { %s2069_s11 = smov 256   ;;  %s2070_s19 = smov 16  }
  0x48   : > { %1652 = dma.hbm_to_vmem [thread:$0]  (!%p1650_p3), %s360_s28, 512, %s362_s6, %s348_s14, %s2069_s11, %s2069_s11, %s2070_s19  }
  0x49   : > { %373 = sbr.rel (%p2227_p0) target bundleno = 452 (0x1c4), region = 44  ;;  %s3226_s1 = sld [smem:[#allocation20_spill]] (!%p2227_p0) }
  0x4f   : > { %s2306_s3 = sand.u32 1, %s3226_s1  }
  0x50   : > { %s1574_s16 = sshll.u32 %s2306_s3, 3  ;;  %s376_s12 = scalar_lea.sflag [#allocation3], %s2306_s3 }
  0x51   : > { %s379_s15 = scalar_lea.vmem [#allocation2], %s1574_s16 }
  0x52   : > { %2006 = dma.done.wait (%p2182_p6), %s376_s12, 128  }
  0x53   : > { %2008 = vsyncadd (%p2182_p6), %s376_s12, 4294967168  ;;  %s385_s13 = sand.u32 1, %s2166_s8   ;;  %s2316_s17 = sshll.u32 %s2306_s3, 2 }
  0x54   : > { %s386_s6 = scalar_lea.sflag [#allocation6], %s385_s13  ;;  %s389_s24 = scalar_lea.vmem [#allocation5], %s2316_s17 }
  0x55   : > { %2010 = dma.done.wait (%p2182_p6), %s386_s6, 128  }
  0x56   : > { %2012 = vsyncadd (%p2182_p6), %s386_s6, 4294967168  ;;  %s399_s28 = scalar_lea.vmem [#allocation7], %s2316_s17  ;;  %s406_s14 = scalar_lea.sflag [#allocation9], %s385_s13 }
  0x57   : > { %s409_s11 = scalar_lea.vmem [#allocation8], %s2316_s17 }
  0x58   : > { %2014 = dma.done.wait (%p2182_p6), %s406_s14, 128  }
  0x59   : > { %2016 = vsyncadd (%p2182_p6), %s406_s14, 4294967168  ;;  %s425_s8 = sand.u32 1, %s2031_s22   ;;  %s419_s9 = scalar_lea.vmem [#allocation10], %s2316_s17 }
  0x5a   : > { %s1579_s19 = sshll.u32 %s425_s8, 5  ;;  %s426_s1 = scalar_lea.sflag [#allocation12], %s425_s8 }
  0x5b   : > { %s2331_s16 = scalar_lea.vmem [#allocation11], %s1579_s19 }
  0x5c   : > { %2018 = dma.done.wait (%p2279_p13), %s426_s1, 512  }
  0x5d   : > { %2020 = vsyncadd (%p2279_p13), %s426_s1, 4294966784  ;;  %s3228_s12 = sld [smem:[#allocation21_spill]]  ;;  %s1619_s13 = smul.u32 24, %s2306_s3 }
  0x5f   : > { %s2339_s10 = scalar_lea.vmem [#allocation13], %s1619_s13 }
  0x63   : > { %p485_p10 = scmp.eq.s32.totalorder %s3228_s12, 0 }
  0x64   : > { %v491_v0 = vld [vmem:[%s379_s15] sm:$0xff] (%p485_p10)  ;;  %v2071_v1 = vmov (%p485_p10), 0.0  }
  0x65   : > { %490 = sbr.rel (!%p485_p10) target bundleno = 106 (0x6a), region = 72  ;;  %492 = vst [vmem:[%s2339_s10] sm:$0xff] (%p485_p10), %v491_v0 }
  0x66   : > { %493 = vst [vmem:[%s2339_s10 + $0x8] sm:$0xff] (%p485_p10), %v2071_v1 }
  0x67   : > { %494 = vst [vmem:[%s2339_s10 + $0x10] sm:$0xff] (%p485_p10), %v2071_v1 }
  0x6a PF: > { %v495_v2 = vld [vmem:[%s389_s24] sm:$0xf]  ;;  %s3229_s17 = sld [smem:[#allocation21_spill]]  ;;  %v498_v4 = vld [vmem:[%s409_s11] sm:$0xf]  ;;  %v510_v6 = vlaneseq  ;;  %s1354_s19 = sshll.u32 %s2339_s10, 4  ;;  %s1355_s19 = int_to_ptr.vmem [resolvable:$true] %s1354_s19 }
  0x6b   : > { %v500_v5 = vld [vmem:[%s419_s9] sm:$0xf]  ;;  %v2345_v7 = vld [vmem:[%s399_s28] sm:$0xf]  ;;  %s3230_s21 = sld [smem:[#allocation22_spill]]  ;;  %s1343_s1 = scalar_lea.sflag [#allocation4], %s2306_s3 }
  0x6c   : > { %v2347_v10 = vshrl.u32 %v510_v6, 7  ;;  %v1581_v11 = vadd.s32 4294967168, %v2345_v7  ;;  %v2378_v26 = vperm.slane %v2345_v7, 0  ;;  %v561_v27 = vadd.s32 1, %v2345_v7  ;;  %s3231_s28 = sld [smem:[#allocation29_spill]] }
  0x6d   : > { %v2415_v43 = vperm.slane %v2345_v7, 1  ;;  %v2428_v48 = vperm.slane %v2345_v7, 2  ;;  %v2441_v58 = vperm.slane %v2345_v7, 3 }
  0x6e   : > { %v2359_v16 = vadd.s32 120, %v2347_v10  ;;  %v2369_v21 = vperm.slane %v1581_v11, 0  ;;  %v946_v22 = vadd.s32 1, %v1581_v11  ;;  %v2371_v23 = vperm.slane %v1581_v11, 1 }
  0x6f   : > { %v2373_v24 = vperm.slane %v1581_v11, 2  ;;  %v2375_v25 = vperm.slane %v1581_v11, 3  ;;  %v2412_v42 = vperm.slane %v561_v27, 0  ;;  %v2420_v46 = vperm.slane %v561_v27, 1 }
  0x70   : > { %v496_v3 = vstv %s3229_s17  ;;  %vm929_vm1 = vcmp.eq.s32.totalorder %v2359_v16, %v2369_v21  ;;  %v2383_v28 = vperm.slane %v946_v22, 0  ;;  %vm1012_vm2 = vcmp.eq.s32.totalorder %v2359_v16, %v2371_v23 }
  0x71   : > { %vm497_vm0 = vcmp.eq.s32.totalorder %v495_v2, %v496_v3  ;;  %v2387_v29 = vperm.slane %v946_v22, 1  ;;  %vm1094_vm3 = vcmp.eq.s32.totalorder %v2359_v16, %v2373_v24  ;;  %v2393_v32 = vperm.slane %v946_v22, 2  ;;  %s1582_s15 = sshll.u32 %s3230_s21, 3 }
  0x72   : > { %v499_v8 = vsel %vm497_vm0, %v498_v4, 0.0  ;;  %v501_v9 = vsel %vm497_vm0, %v500_v5, 0.0  ;;  %vm963_vm4 = vcmp.eq.s32.totalorder %v2359_v16, %v2383_v28  ;;  %vm1176_vm6 = vcmp.eq.s32.totalorder %v2359_v16, %v2375_v25  ;;  %s3232_s14 = smov %s3231_s28  ;;  %s1353_s11 = scalar_lea.hbm %s3231_s28, %s1582_s15 }
  0x73   : > { %v2350_v12 = vperm.slane %v499_v8, 0  ;;  %v2352_v13 = vperm.slane %v501_v9, 0  ;;  %v2354_v14 = vperm.slane %v499_v8, 1  ;;  %v2356_v15 = vperm.slane %v501_v9, 1  ;;  %s1356_s9 = sshll.u32 %s1353_s11, 4  ;;  %s1953_s21 = scalar_lea.hbm %s3232_s14, 48  ;;  %s1357_s9 = int_to_ptr.hbm [resolvable:$true] %s1356_s9 }
  0x74   : > { %v2361_v17 = vperm.slane %v499_v8, 2  ;;  %v2363_v18 = vperm.slane %v501_v9, 2  ;;  %v2365_v19 = vperm.slane %v499_v8, 3  ;;  %v2367_v20 = vperm.slane %v501_v9, 3 }
  0x75   : > { %v945_v30 = vsel %vm929_vm1, %v2350_v12, 0.0  ;;  %v1028_v31 = vsel %vm1012_vm2, %v2354_v14, 0.0  ;;  %vm1045_vm5 = vcmp.eq.s32.totalorder %v2359_v16, %v2387_v29  ;;  %v979_v34 = vsel %vm963_vm4, %v2352_v13, 0.0 }
  0x76   : > { %v1110_v33 = vsel %vm1094_vm3, %v2361_v17, 0.0  ;;  %v1061_v35 = vsel %vm1045_vm5, %v2356_v15, 0.0  ;;  %vm1127_vm7 = vcmp.eq.s32.totalorder %v2359_v16, %v2393_v32  ;;  %v1192_v36 = vsel %vm1176_vm6, %v2365_v19, 0.0 }
  0x77   : > { %v995_v37 = vadd.f32 %v979_v34, %v945_v30  ;;  %v1077_v38 = vadd.f32 %v1061_v35, %v1028_v31  ;;  %v1143_v39 = vsel %vm1127_vm7, %v2363_v18, 0.0  ;;  %v2408_v40 = vperm.slane %v946_v22, 3 }
  0x78   : > { %v1159_v41 = vadd.f32 %v1143_v39, %v1110_v33  ;;  %vm543_vm8 = vcmp.eq.s32.totalorder %v2359_v16, %v2378_v26  ;;  %vm578_vm10 = vcmp.eq.s32.totalorder %v2359_v16, %v2412_v42  ;;  %vm628_vm11 = vcmp.eq.s32.totalorder %v2359_v16, %v2415_v43 }
  0x79   : > { %vm1209_vm9 = vcmp.eq.s32.totalorder %v2359_v16, %v2408_v40  ;;  %v1257_v44 = vadd.f32 %v1077_v38, %v995_v37  ;;  %v560_v45 = vsel %vm543_vm8, %v2350_v12, 0.0  ;;  %v595_v50 = vsel %vm578_vm10, %v2352_v13, 0.0 }
  0x7a   : > { %v1225_v47 = vsel %vm1209_vm9, %v2367_v20, 0.0  ;;  %v645_v51 = vsel %vm628_vm11, %v2354_v14, 0.0  ;;  %vm662_vm12 = vcmp.eq.s32.totalorder %v2359_v16, %v2420_v46  ;;  %v611_v52 = vadd.f32 %v595_v50, %v560_v45 }
  0x7b   : > { %v1241_v49 = vadd.f32 %v1225_v47, %v1192_v36  ;;  %v679_v53 = vsel %vm662_vm12, %v2356_v15, 0.0  ;;  %vm712_vm13 = vcmp.eq.s32.totalorder %v2359_v16, %v2428_v48  ;;  %v2437_v54 = vperm.slane %v561_v27, 2 }
  0x7c   : > { %v695_v56 = vadd.f32 %v679_v53, %v645_v51  ;;  %v729_v57 = vsel %vm712_vm13, %v2361_v17, 0.0  ;;  %v2445_v59 = vperm.slane %v561_v27, 3  ;;  %v525_v60 = vadd.s32 112, %v2347_v10 }
  0x7d   : > { %v1273_v55 = vadd.f32 %v1241_v49, %v1159_v41  ;;  %vm746_vm14 = vcmp.eq.s32.totalorder %v2359_v16, %v2437_v54  ;;  %v2449_v61 = vadd.s32 104, %v2347_v10  ;;  %vm796_vm15 = vcmp.eq.s32.totalorder %v2359_v16, %v2441_v58 }
  0x7e   : > { %v763_v63 = vsel %vm746_vm14, %v2363_v18, 0.0  ;;  %v879_v0 = vadd.f32 %v695_v56, %v611_v52  ;;  %v813_v2 = vsel %vm796_vm15, %v2365_v19, 0.0  ;;  %vm830_vm0 = vcmp.eq.s32.totalorder %v2359_v16, %v2445_v59 }
  0x7f   : > { %v1289_v62 = vadd.f32 %v1273_v55, %v1257_v44  ;;  %v779_v1 = vadd.f32 %v763_v63, %v729_v57  ;;  %vm928_vm1 = vcmp.eq.s32.totalorder %v525_v60, %v2369_v21  ;;  %v847_v3 = vsel %vm830_vm0, %v2367_v20, 0.0 }
  0x80   : > { %v944_v4 = vsel %vm928_vm1, %v2350_v12, 0.0  ;;  %vm962_vm2 = vcmp.eq.s32.totalorder %v525_v60, %v2383_v28  ;;  %vm1011_vm3 = vcmp.eq.s32.totalorder %v525_v60, %v2371_v23  ;;  %v863_v5 = vadd.f32 %v847_v3, %v813_v2 }
  0x81   : > { %1587 = vmatpush.msra.mxu2 %v1289_v62  ;;  %1290 = vmatpush.msra.mxu0 %v1289_v62  ;;  %v978_v6 = vsel %vm962_vm2, %v2352_v13, 0.0  ;;  %v1027_v7 = vsel %vm1011_vm3, %v2354_v14, 0.0  ;;  %vm1044_vm4 = vcmp.eq.s32.totalorder %v525_v60, %v2387_v29  ;;  %vm1093_vm5 = vcmp.eq.s32.totalorder %v525_v60, %v2373_v24 }
  0x82   : > { %v994_v8 = vadd.f32 %v978_v6, %v944_v4  ;;  %v1060_v9 = vsel %vm1044_vm4, %v2356_v15, 0.0  ;;  %vm1126_vm6 = vcmp.eq.s32.totalorder %v525_v60, %v2393_v32  ;;  %v895_v11 = vadd.f32 %v863_v5, %v779_v1 }
  0x83   : > { %v1076_v16 = vadd.f32 %v1060_v9, %v1027_v7  ;;  %v1109_v22 = vsel %vm1093_vm5, %v2361_v17, 0.0  ;;  %v1142_v27 = vsel %vm1126_vm6, %v2363_v18, 0.0  ;;  %vm1175_vm7 = vcmp.eq.s32.totalorder %v525_v60, %v2375_v25 }
  0x84   : > { %v1158_v30 = vadd.f32 %v1142_v27, %v1109_v22  ;;  %vm1208_vm8 = vcmp.eq.s32.totalorder %v525_v60, %v2408_v40  ;;  %vm542_vm9 = vcmp.eq.s32.totalorder %v525_v60, %v2378_v26  ;;  %v911_v31 = vadd.f32 %v895_v11, %v879_v0 }
  0x85   : > { %v1191_v33 = vsel %vm1175_vm7, %v2365_v19, 0.0  ;;  %v1224_v34 = vsel %vm1208_vm8, %v2367_v20, 0.0  ;;  %v1256_v35 = vadd.f32 %v1076_v16, %v994_v8  ;;  %v559_v37 = vsel %vm542_vm9, %v2350_v12, 0.0 }
  0x86   : > { %v1240_v36 = vadd.f32 %v1224_v34, %v1191_v33  ;;  %vm577_vm10 = vcmp.eq.s32.totalorder %v525_v60, %v2412_v42  ;;  %vm627_vm11 = vcmp.eq.s32.totalorder %v525_v60, %v2415_v43  ;;  %1603 = vmatpush.msra.mxu3 %v911_v31  ;;  %vm661_vm12 = vcmp.eq.s32.totalorder %v525_v60, %v2420_v46 }
  0x87   : > { %v594_v38 = vsel %vm577_vm10, %v2352_v13, 0.0  ;;  %v644_v39 = vsel %vm627_vm11, %v2354_v14, 0.0  ;;  %vm711_vm13 = vcmp.eq.s32.totalorder %v525_v60, %v2428_v48  ;;  %1313 = vmatpush.msra.mxu1 %v911_v31  ;;  %v678_v45 = vsel %vm661_vm12, %v2356_v15, 0.0 }
  0x88   : > { %v1272_v41 = vadd.f32 %v1240_v36, %v1158_v30  ;;  %v610_v44 = vadd.f32 %v594_v38, %v559_v37  ;;  %v728_v47 = vsel %vm711_vm13, %v2361_v17, 0.0  ;;  %v694_v49 = vadd.f32 %v678_v45, %v644_v39 }
  0x89   : > { %vm745_vm14 = vcmp.eq.s32.totalorder %v525_v60, %v2437_v54  ;;  %vm795_vm15 = vcmp.eq.s32.totalorder %v525_v60, %v2441_v58  ;;  %vm829_vm0 = vcmp.eq.s32.totalorder %v525_v60, %v2445_v59  ;;  %vm927_vm1 = vcmp.eq.s32.totalorder %v2449_v61, %v2369_v21 }
  0x8a   : > { %v1288_v50 = vadd.f32 %v1272_v41, %v1256_v35  ;;  %v762_v51 = vsel %vm745_vm14, %v2363_v18, 0.0  ;;  %v812_v52 = vsel %vm795_vm15, %v2365_v19, 0.0  ;;  %v846_v53 = vsel %vm829_vm0, %v2367_v20, 0.0 }
  0x8b   : > { %v778_v55 = vadd.f32 %v762_v51, %v728_v47  ;;  %v862_v56 = vadd.f32 %v846_v53, %v812_v52  ;;  %v878_v57 = vadd.f32 %v694_v49, %v610_v44  ;;  %v943_v62 = vsel %vm927_vm1, %v2350_v12, 0.0 }
  0x8c   : > { %1588 = vmatpush.msra.mxu2 %v1288_v50  ;;  %vm961_vm2 = vcmp.eq.s32.totalorder %v2449_v61, %v2383_v28  ;;  %vm1010_vm3 = vcmp.eq.s32.totalorder %v2449_v61, %v2371_v23  ;;  %vm1043_vm4 = vcmp.eq.s32.totalorder %v2449_v61, %v2387_v29  ;;  %1291 = vmatpush.msra.mxu0 %v1288_v50  ;;  %v523_v45 = vadd.s32 96, %v2347_v10 }
  0x8d   : > { %v894_v60 = vadd.f32 %v862_v56, %v778_v55  ;;  %v977_v63 = vsel %vm961_vm2, %v2352_v13, 0.0  ;;  %v1026_v0 = vsel %vm1010_vm3, %v2354_v14, 0.0  ;;  %v1059_v1 = vsel %vm1043_vm4, %v2356_v15, 0.0 }
  0x8e   : > { %v993_v2 = vadd.f32 %v977_v63, %v943_v62  ;;  %v1075_v3 = vadd.f32 %v1059_v1, %v1026_v0  ;;  %vm1092_vm5 = vcmp.eq.s32.totalorder %v2449_v61, %v2373_v24  ;;  %vm1125_vm6 = vcmp.eq.s32.totalorder %v2449_v61, %v2393_v32 }
  0x8f   : > { %v910_v4 = vadd.f32 %v894_v60, %v878_v57  ;;  %v1108_v5 = vsel %vm1092_vm5, %v2361_v17, 0.0  ;;  %v1141_v6 = vsel %vm1125_vm6, %v2363_v18, 0.0  ;;  %vm1174_vm7 = vcmp.eq.s32.totalorder %v2449_v61, %v2375_v25 }
  0x90   : > { %v1157_v7 = vadd.f32 %v1141_v6, %v1108_v5  ;;  %v1190_v8 = vsel %vm1174_vm7, %v2365_v19, 0.0  ;;  %vm1207_vm8 = vcmp.eq.s32.totalorder %v2449_v61, %v2408_v40  ;;  %v1255_v9 = vadd.f32 %v1075_v3, %v993_v2 }
  0x91   : > { %1604 = vmatpush.msra.mxu3 %v910_v4  ;;  %v1223_v11 = vsel %vm1207_vm8, %v2367_v20, 0.0  ;;  %vm541_vm9 = vcmp.eq.s32.totalorder %v2449_v61, %v2378_v26  ;;  %vm576_vm10 = vcmp.eq.s32.totalorder %v2449_v61, %v2412_v42  ;;  %vm626_vm11 = vcmp.eq.s32.totalorder %v2449_v61, %v2415_v43  ;;  %1314 = vmatpush.msra.mxu1 %v910_v4 }
  0x92   : > { %v1239_v16 = vadd.f32 %v1223_v11, %v1190_v8  ;;  %v558_v22 = vsel %vm541_vm9, %v2350_v12, 0.0  ;;  %v593_v27 = vsel %vm576_vm10, %v2352_v13, 0.0  ;;  %v643_v30 = vsel %vm626_vm11, %v2354_v14, 0.0 }
  0x93   : > { %v609_v31 = vadd.f32 %v593_v27, %v558_v22  ;;  %vm660_vm12 = vcmp.eq.s32.totalorder %v2449_v61, %v2420_v46  ;;  %vm710_vm13 = vcmp.eq.s32.totalorder %v2449_v61, %v2428_v48  ;;  %vm744_vm14 = vcmp.eq.s32.totalorder %v2449_v61, %v2437_v54 }
  0x94   : > { %v1271_v33 = vadd.f32 %v1239_v16, %v1157_v7  ;;  %v677_v34 = vsel %vm660_vm12, %v2356_v15, 0.0  ;;  %v727_v35 = vsel %vm710_vm13, %v2361_v17, 0.0  ;;  %v761_v36 = vsel %vm744_vm14, %v2363_v18, 0.0 }
  0x95   : > { %v693_v37 = vadd.f32 %v677_v34, %v643_v30  ;;  %v777_v38 = vadd.f32 %v761_v36, %v727_v35  ;;  %vm794_vm15 = vcmp.eq.s32.totalorder %v2449_v61, %v2441_v58  ;;  %vm828_vm0 = vcmp.eq.s32.totalorder %v2449_v61, %v2445_v59 }
  0x96   : > { %v1287_v39 = vadd.f32 %v1271_v33, %v1255_v9  ;;  %v811_v41 = vsel %vm794_vm15, %v2365_v19, 0.0  ;;  %v845_v44 = vsel %vm828_vm0, %v2367_v20, 0.0  ;;  %v2540_v50 = vadd.s32 88, %v2347_v10 }
  0x97   : > { %v861_v47 = vadd.f32 %v845_v44, %v811_v41  ;;  %v877_v49 = vadd.f32 %v693_v37, %v609_v31  ;;  %v2543_v51 = vadd.s32 80, %v2347_v10  ;;  %vm926_vm1 = vcmp.eq.s32.totalorder %v523_v45, %v2369_v21 }
  0x98   : > { %1589 = vmatpush.msra.mxu2 %v1287_v39  ;;  %vm960_vm2 = vcmp.eq.s32.totalorder %v523_v45, %v2383_v28  ;;  %vm1009_vm3 = vcmp.eq.s32.totalorder %v523_v45, %v2371_v23  ;;  %vm1042_vm4 = vcmp.eq.s32.totalorder %v523_v45, %v2387_v29  ;;  %v942_v52 = vsel %vm926_vm1, %v2350_v12, 0.0  ;;  %1292 = vmatpush.msra.mxu0 %v1287_v39 }
  0x99   : > { %v893_v61 = vadd.f32 %v861_v47, %v777_v38  ;;  %v976_v53 = vsel %vm960_vm2, %v2352_v13, 0.0  ;;  %v1025_v55 = vsel %vm1009_vm3, %v2354_v14, 0.0  ;;  %v1058_v57 = vsel %vm1042_vm4, %v2356_v15, 0.0 }
  0x9a   : > { %v992_v56 = vadd.f32 %v976_v53, %v942_v52  ;;  %vm1091_vm5 = vcmp.eq.s32.totalorder %v523_v45, %v2373_v24  ;;  %vm1124_vm6 = vcmp.eq.s32.totalorder %v523_v45, %v2393_v32  ;;  %v1074_v60 = vadd.f32 %v1058_v57, %v1025_v55 }
  0x9b   : > { %v909_v62 = vadd.f32 %v893_v61, %v877_v49  ;;  %v1107_v63 = vsel %vm1091_vm5, %v2361_v17, 0.0  ;;  %v1140_v0 = vsel %vm1124_vm6, %v2363_v18, 0.0  ;;  %vm1173_vm7 = vcmp.eq.s32.totalorder %v523_v45, %v2375_v25 }
  0x9c   : > { %v1156_v1 = vadd.f32 %v1140_v0, %v1107_v63  ;;  %vm1206_vm8 = vcmp.eq.s32.totalorder %v523_v45, %v2408_v40  ;;  %vm540_vm9 = vcmp.eq.s32.totalorder %v523_v45, %v2378_v26  ;;  %v1189_v2 = vsel %vm1173_vm7, %v2365_v19, 0.0 }
  0x9d   : > { %1605 = vmatpush.msra.mxu3 %v909_v62  ;;  %v1222_v3 = vsel %vm1206_vm8, %v2367_v20, 0.0  ;;  %v1254_v4 = vadd.f32 %v1074_v60, %v992_v56  ;;  %v557_v5 = vsel %vm540_vm9, %v2350_v12, 0.0  ;;  %1315 = vmatpush.msra.mxu1 %v909_v62  ;;  %vm575_vm10 = vcmp.eq.s32.totalorder %v523_v45, %v2412_v42 }
  0x9e   : > { %v1238_v6 = vadd.f32 %v1222_v3, %v1189_v2  ;;  %vm625_vm11 = vcmp.eq.s32.totalorder %v523_v45, %v2415_v43  ;;  %vm659_vm12 = vcmp.eq.s32.totalorder %v523_v45, %v2420_v46  ;;  %v592_v7 = vsel %vm575_vm10, %v2352_v13, 0.0 }
  0x9f   : > { %v642_v8 = vsel %vm625_vm11, %v2354_v14, 0.0  ;;  %v676_v9 = vsel %vm659_vm12, %v2356_v15, 0.0  ;;  %vm709_vm13 = vcmp.eq.s32.totalorder %v523_v45, %v2428_v48  ;;  %v608_v16 = vadd.f32 %v592_v7, %v557_v5 }
  0xa0   : > { %v1270_v11 = vadd.f32 %v1238_v6, %v1156_v1  ;;  %v692_v22 = vadd.f32 %v676_v9, %v642_v8  ;;  %v726_v27 = vsel %vm709_vm13, %v2361_v17, 0.0  ;;  %vm743_vm14 = vcmp.eq.s32.totalorder %v523_v45, %v2437_v54 }
  0xa1   : > { %vm793_vm15 = vcmp.eq.s32.totalorder %v523_v45, %v2441_v58  ;;  %vm827_vm0 = vcmp.eq.s32.totalorder %v523_v45, %v2445_v59  ;;  %vm925_vm1 = vcmp.eq.s32.totalorder %v2540_v50, %v2369_v21  ;;  %v760_v31 = vsel %vm743_vm14, %v2363_v18, 0.0 }
  0xa2   : > { %v1286_v30 = vadd.f32 %v1270_v11, %v1254_v4  ;;  %v810_v33 = vsel %vm793_vm15, %v2365_v19, 0.0  ;;  %v844_v34 = vsel %vm827_vm0, %v2367_v20, 0.0  ;;  %v776_v35 = vadd.f32 %v760_v31, %v726_v27 }
  0xa3   : > { %v860_v36 = vadd.f32 %v844_v34, %v810_v33  ;;  %v876_v37 = vadd.f32 %v692_v22, %v608_v16  ;;  %v941_v38 = vsel %vm925_vm1, %v2350_v12, 0.0  ;;  %vm959_vm2 = vcmp.eq.s32.totalorder %v2540_v50, %v2383_v28 }
  0xa4   : > { %1590 = vmatpush.msra.mxu2 %v1286_v30  ;;  %vm1008_vm3 = vcmp.eq.s32.totalorder %v2540_v50, %v2371_v23  ;;  %vm1041_vm4 = vcmp.eq.s32.totalorder %v2540_v50, %v2387_v29  ;;  %vm1090_vm5 = vcmp.eq.s32.totalorder %v2540_v50, %v2373_v24  ;;  %v975_v41 = vsel %vm959_vm2, %v2352_v13, 0.0  ;;  %1293 = vmatpush.msra.mxu0 %v1286_v30 }
  0xa5   : > { %v892_v39 = vadd.f32 %v860_v36, %v776_v35  ;;  %v1024_v44 = vsel %vm1008_vm3, %v2354_v14, 0.0  ;;  %v1057_v45 = vsel %vm1041_vm4, %v2356_v15, 0.0  ;;  %v991_v47 = vadd.f32 %v975_v41, %v941_v38 }
  0xa6   : > { %v1073_v49 = vadd.f32 %v1057_v45, %v1024_v44  ;;  %v1106_v61 = vsel %vm1090_vm5, %v2361_v17, 0.0  ;;  %vm1123_vm6 = vcmp.eq.s32.totalorder %v2540_v50, %v2393_v32  ;;  %vm1172_vm7 = vcmp.eq.s32.totalorder %v2540_v50, %v2375_v25 }
  0xa7   : > { %v908_v52 = vadd.f32 %v892_v39, %v876_v37  ;;  %v1139_v53 = vsel %vm1123_vm6, %v2363_v18, 0.0  ;;  %vm1205_vm8 = vcmp.eq.s32.totalorder %v2540_v50, %v2408_v40  ;;  %v1188_v56 = vsel %vm1172_vm7, %v2365_v19, 0.0 }
  0xa8   : > { %v1155_v55 = vadd.f32 %v1139_v53, %v1106_v61  ;;  %v1221_v57 = vsel %vm1205_vm8, %v2367_v20, 0.0  ;;  %v1253_v62 = vadd.f32 %v1073_v49, %v991_v47  ;;  %vm539_vm9 = vcmp.eq.s32.totalorder %v2540_v50, %v2378_v26 }
  0xa9   : > { %1606 = vmatpush.msra.mxu3 %v908_v52  ;;  %v1237_v60 = vadd.f32 %v1221_v57, %v1188_v56  ;;  %vm574_vm10 = vcmp.eq.s32.totalorder %v2540_v50, %v2412_v42  ;;  %vm624_vm11 = vcmp.eq.s32.totalorder %v2540_v50, %v2415_v43  ;;  %v556_v63 = vsel %vm539_vm9, %v2350_v12, 0.0  ;;  %1316 = vmatpush.msra.mxu1 %v908_v52 }
  0xaa   : > { %v591_v0 = vsel %vm574_vm10, %v2352_v13, 0.0  ;;  %v641_v1 = vsel %vm624_vm11, %v2354_v14, 0.0  ;;  %vm658_vm12 = vcmp.eq.s32.totalorder %v2540_v50, %v2420_v46  ;;  %vm708_vm13 = vcmp.eq.s32.totalorder %v2540_v50, %v2428_v48 }
  0xab   : > { %v1269_v2 = vadd.f32 %v1237_v60, %v1155_v55  ;;  %v607_v3 = vadd.f32 %v591_v0, %v556_v63  ;;  %v675_v4 = vsel %vm658_vm12, %v2356_v15, 0.0  ;;  %v725_v6 = vsel %vm708_vm13, %v2361_v17, 0.0 }
  0xac   : > { %v691_v5 = vadd.f32 %v675_v4, %v641_v1  ;;  %vm742_vm14 = vcmp.eq.s32.totalorder %v2540_v50, %v2437_v54  ;;  %vm792_vm15 = vcmp.eq.s32.totalorder %v2540_v50, %v2441_v58  ;;  %vm826_vm0 = vcmp.eq.s32.totalorder %v2540_v50, %v2445_v59 }
  0xad   : > { %v1285_v7 = vadd.f32 %v1269_v2, %v1253_v62  ;;  %v759_v8 = vsel %vm742_vm14, %v2363_v18, 0.0  ;;  %v809_v9 = vsel %vm792_vm15, %v2365_v19, 0.0  ;;  %v843_v16 = vsel %vm826_vm0, %v2367_v20, 0.0 }
  0xae   : > { %v775_v11 = vadd.f32 %v759_v8, %v725_v6  ;;  %v875_v22 = vadd.f32 %v691_v5, %v607_v3  ;;  %vm924_vm1 = vcmp.eq.s32.totalorder %v2543_v51, %v2369_v21  ;;  %v859_v27 = vadd.f32 %v843_v16, %v809_v9 }
  0xaf   : > { %1591 = vmatpush.msra.mxu2 %v1285_v7  ;;  %v940_v30 = vsel %vm924_vm1, %v2350_v12, 0.0  ;;  %vm958_vm2 = vcmp.eq.s32.totalorder %v2543_v51, %v2383_v28  ;;  %vm1007_vm3 = vcmp.eq.s32.totalorder %v2543_v51, %v2371_v23  ;;  %1294 = vmatpush.msra.mxu0 %v1285_v7  ;;  %vm1040_vm4 = vcmp.eq.s32.totalorder %v2543_v51, %v2387_v29 }
  0xb0   : > { %v974_v50 = vsel %vm958_vm2, %v2352_v13, 0.0  ;;  %v1023_v31 = vsel %vm1007_vm3, %v2354_v14, 0.0  ;;  %vm1089_vm5 = vcmp.eq.s32.totalorder %v2543_v51, %v2373_v24  ;;  %v891_v33 = vadd.f32 %v859_v27, %v775_v11 }
  0xb1   : > { %v990_v34 = vadd.f32 %v974_v50, %v940_v30  ;;  %v1056_v35 = vsel %vm1040_vm4, %v2356_v15, 0.0  ;;  %v1105_v36 = vsel %vm1089_vm5, %v2361_v17, 0.0  ;;  %vm1122_vm6 = vcmp.eq.s32.totalorder %v2543_v51, %v2393_v32 }
  0xb2   : > { %v1072_v37 = vadd.f32 %v1056_v35, %v1023_v31  ;;  %vm1171_vm7 = vcmp.eq.s32.totalorder %v2543_v51, %v2375_v25  ;;  %vm1204_vm8 = vcmp.eq.s32.totalorder %v2543_v51, %v2408_v40  ;;  %v907_v38 = vadd.f32 %v891_v33, %v875_v22 }
  0xb3   : > { %v1138_v39 = vsel %vm1122_vm6, %v2363_v18, 0.0  ;;  %v1187_v41 = vsel %vm1171_vm7, %v2365_v19, 0.0  ;;  %v1220_v44 = vsel %vm1204_vm8, %v2367_v20, 0.0  ;;  %vm538_vm9 = vcmp.eq.s32.totalorder %v2543_v51, %v2378_v26 }
  0xb4   : > { %v1154_v45 = vadd.f32 %v1138_v39, %v1105_v36  ;;  %v1236_v47 = vadd.f32 %v1220_v44, %v1187_v41  ;;  %v1252_v49 = vadd.f32 %v1072_v37, %v990_v34  ;;  %1607 = vmatpush.msra.mxu3 %v907_v38  ;;  %v555_v61 = vsel %vm538_vm9, %v2350_v12, 0.0  ;;  %1317 = vmatpush.msra.mxu1 %v907_v38 }
  0xb5   : > { %vm573_vm10 = vcmp.eq.s32.totalorder %v2543_v51, %v2412_v42  ;;  %vm623_vm11 = vcmp.eq.s32.totalorder %v2543_v51, %v2415_v43  ;;  %vm657_vm12 = vcmp.eq.s32.totalorder %v2543_v51, %v2420_v46  ;;  %vm707_vm13 = vcmp.eq.s32.totalorder %v2543_v51, %v2428_v48 }
  0xb6   : > { %v1268_v52 = vadd.f32 %v1236_v47, %v1154_v45  ;;  %v590_v53 = vsel %vm573_vm10, %v2352_v13, 0.0  ;;  %v640_v55 = vsel %vm623_vm11, %v2354_v14, 0.0  ;;  %v674_v56 = vsel %vm657_vm12, %v2356_v15, 0.0 }
  0xb7   : > { %v606_v57 = vadd.f32 %v590_v53, %v555_v61  ;;  %v690_v62 = vadd.f32 %v674_v56, %v640_v55  ;;  %vm741_vm14 = vcmp.eq.s32.totalorder %v2543_v51, %v2437_v54  ;;  %v724_v63 = vsel %vm707_vm13, %v2361_v17, 0.0 }
  0xb8   : > { %v1284_v60 = vadd.f32 %v1268_v52, %v1252_v49  ;;  %v758_v0 = vsel %vm741_vm14, %v2363_v18, 0.0  ;;  %vm791_vm15 = vcmp.eq.s32.totalorder %v2543_v51, %v2441_v58  ;;  %vm825_vm0 = vcmp.eq.s32.totalorder %v2543_v51, %v2445_v59 }
  0xb9   : > { %v774_v1 = vadd.f32 %v758_v0, %v724_v63  ;;  %v808_v2 = vsel %vm791_vm15, %v2365_v19, 0.0  ;;  %v842_v3 = vsel %vm825_vm0, %v2367_v20, 0.0  ;;  %v520_v4 = vadd.s32 72, %v2347_v10 }
  0xba   : > { %1592 = vmatpush.msra.mxu2 %v1284_v60  ;;  %1295 = vmatpush.msra.mxu0 %v1284_v60  ;;  %v858_v5 = vadd.f32 %v842_v3, %v808_v2  ;;  %v874_v6 = vadd.f32 %v690_v62, %v606_v57  ;;  %v2675_v7 = vadd.s32 64, %v2347_v10  ;;  %v2678_v8 = vadd.s32 56, %v2347_v10 }
  0xbb   : > { %vm923_vm1 = vcmp.eq.s32.totalorder %v520_v4, %v2369_v21  ;;  %vm957_vm2 = vcmp.eq.s32.totalorder %v520_v4, %v2383_v28  ;;  %vm1006_vm3 = vcmp.eq.s32.totalorder %v520_v4, %v2371_v23  ;;  %vm1039_vm4 = vcmp.eq.s32.totalorder %v520_v4, %v2387_v29 }
  0xbc   : > { %v890_v51 = vadd.f32 %v858_v5, %v774_v1  ;;  %v939_v9 = vsel %vm923_vm1, %v2350_v12, 0.0  ;;  %v973_v11 = vsel %vm957_vm2, %v2352_v13, 0.0  ;;  %v1022_v16 = vsel %vm1006_vm3, %v2354_v14, 0.0 }
  0xbd   : > { %v989_v22 = vadd.f32 %v973_v11, %v939_v9  ;;  %v1055_v27 = vsel %vm1039_vm4, %v2356_v15, 0.0  ;;  %vm1088_vm5 = vcmp.eq.s32.totalorder %v520_v4, %v2373_v24  ;;  %vm1121_vm6 = vcmp.eq.s32.totalorder %v520_v4, %v2393_v32 }
  0xbe   : > { %v906_v30 = vadd.f32 %v890_v51, %v874_v6  ;;  %v1071_v50 = vadd.f32 %v1055_v27, %v1022_v16  ;;  %v1104_v31 = vsel %vm1088_vm5, %v2361_v17, 0.0  ;;  %v1137_v33 = vsel %vm1121_vm6, %v2363_v18, 0.0 }
  0xbf   : > { %v1153_v34 = vadd.f32 %v1137_v33, %v1104_v31  ;;  %vm1170_vm7 = vcmp.eq.s32.totalorder %v520_v4, %v2375_v25  ;;  %vm1203_vm8 = vcmp.eq.s32.totalorder %v520_v4, %v2408_v40  ;;  %vm537_vm9 = vcmp.eq.s32.totalorder %v520_v4, %v2378_v26 }
  0xc0   : > { %1608 = vmatpush.msra.mxu3 %v906_v30  ;;  %v1186_v35 = vsel %vm1170_vm7, %v2365_v19, 0.0  ;;  %v1219_v36 = vsel %vm1203_vm8, %v2367_v20, 0.0  ;;  %v1251_v37 = vadd.f32 %v1071_v50, %v989_v22  ;;  %v554_v38 = vsel %vm537_vm9, %v2350_v12, 0.0  ;;  %1318 = vmatpush.msra.mxu1 %v906_v30 }
  0xc1   : > { %v1235_v39 = vadd.f32 %v1219_v36, %v1186_v35  ;;  %vm572_vm10 = vcmp.eq.s32.totalorder %v520_v4, %v2412_v42  ;;  %vm622_vm11 = vcmp.eq.s32.totalorder %v520_v4, %v2415_v43  ;;  %vm656_vm12 = vcmp.eq.s32.totalorder %v520_v4, %v2420_v46 }
  0xc2   : > { %v589_v41 = vsel %vm572_vm10, %v2352_v13, 0.0  ;;  %v639_v44 = vsel %vm622_vm11, %v2354_v14, 0.0  ;;  %v673_v45 = vsel %vm656_vm12, %v2356_v15, 0.0  ;;  %vm706_vm13 = vcmp.eq.s32.totalorder %v520_v4, %v2428_v48 }
  0xc3   : > { %v1267_v47 = vadd.f32 %v1235_v39, %v1153_v34  ;;  %v605_v49 = vadd.f32 %v589_v41, %v554_v38  ;;  %v689_v61 = vadd.f32 %v673_v45, %v639_v44  ;;  %v723_v52 = vsel %vm706_vm13, %v2361_v17, 0.0 }
  0xc4   : > { %vm740_vm14 = vcmp.eq.s32.totalorder %v520_v4, %v2437_v54  ;;  %vm790_vm15 = vcmp.eq.s32.totalorder %v520_v4, %v2441_v58  ;;  %vm824_vm0 = vcmp.eq.s32.totalorder %v520_v4, %v2445_v59  ;;  %vm922_vm1 = vcmp.eq.s32.totalorder %v2675_v7, %v2369_v21 }
  0xc5   : > { %v1283_v53 = vadd.f32 %v1267_v47, %v1251_v37  ;;  %v757_v55 = vsel %vm740_vm14, %v2363_v18, 0.0  ;;  %v807_v56 = vsel %vm790_vm15, %v2365_v19, 0.0  ;;  %v841_v57 = vsel %vm824_vm0, %v2367_v20, 0.0 }
  0xc6   : > { %v773_v62 = vadd.f32 %v757_v55, %v723_v52  ;;  %v857_v60 = vadd.f32 %v841_v57, %v807_v56  ;;  %v873_v63 = vadd.f32 %v689_v61, %v605_v49  ;;  %v938_v0 = vsel %vm922_vm1, %v2350_v12, 0.0 }
  0xc7   : > { %1593 = vmatpush.msra.mxu2 %v1283_v53  ;;  %vm956_vm2 = vcmp.eq.s32.totalorder %v2675_v7, %v2383_v28  ;;  %vm1005_vm3 = vcmp.eq.s32.totalorder %v2675_v7, %v2371_v23  ;;  %vm1038_vm4 = vcmp.eq.s32.totalorder %v2675_v7, %v2387_v29  ;;  %vm1087_vm5 = vcmp.eq.s32.totalorder %v2675_v7, %v2373_v24 }
  0xc8   : > { %v889_v1 = vadd.f32 %v857_v60, %v773_v62  ;;  %v972_v2 = vsel %vm956_vm2, %v2352_v13, 0.0  ;;  %v1021_v3 = vsel %vm1005_vm3, %v2354_v14, 0.0  ;;  %v1054_v4 = vsel %vm1038_vm4, %v2356_v15, 0.0  ;;  %1296 = vmatpush.msra.mxu0 %v1283_v53 }
  0xc9   : > { %v988_v5 = vadd.f32 %v972_v2, %v938_v0  ;;  %v1070_v6 = vadd.f32 %v1054_v4, %v1021_v3  ;;  %v1103_v51 = vsel %vm1087_vm5, %v2361_v17, 0.0  ;;  %vm1120_vm6 = vcmp.eq.s32.totalorder %v2675_v7, %v2393_v32 }
  0xca   : > { %v905_v9 = vadd.f32 %v889_v1, %v873_v63  ;;  %v1136_v11 = vsel %vm1120_vm6, %v2363_v18, 0.0  ;;  %vm1169_vm7 = vcmp.eq.s32.totalorder %v2675_v7, %v2375_v25  ;;  %vm1202_vm8 = vcmp.eq.s32.totalorder %v2675_v7, %v2408_v40 }
  0xcb   : > { %v1152_v16 = vadd.f32 %v1136_v11, %v1103_v51  ;;  %v1185_v22 = vsel %vm1169_vm7, %v2365_v19, 0.0  ;;  %v1218_v27 = vsel %vm1202_vm8, %v2367_v20, 0.0  ;;  %v1250_v30 = vadd.f32 %v1070_v6, %v988_v5 }
  0xcc   : > { %1609 = vmatpush.msra.mxu3 %v905_v9  ;;  %v1234_v50 = vadd.f32 %v1218_v27, %v1185_v22  ;;  %vm536_vm9 = vcmp.eq.s32.totalorder %v2675_v7, %v2378_v26  ;;  %vm571_vm10 = vcmp.eq.s32.totalorder %v2675_v7, %v2412_v42  ;;  %vm621_vm11 = vcmp.eq.s32.totalorder %v2675_v7, %v2415_v43 }
  0xcd   : > { %v553_v31 = vsel %vm536_vm9, %v2350_v12, 0.0  ;;  %v588_v33 = vsel %vm571_vm10, %v2352_v13, 0.0  ;;  %v638_v34 = vsel %vm621_vm11, %v2354_v14, 0.0  ;;  %vm655_vm12 = vcmp.eq.s32.totalorder %v2675_v7, %v2420_v46  ;;  %1319 = vmatpush.msra.mxu1 %v905_v9 }
  0xce   : > { %v1266_v35 = vadd.f32 %v1234_v50, %v1152_v16  ;;  %v604_v36 = vadd.f32 %v588_v33, %v553_v31  ;;  %v672_v37 = vsel %vm655_vm12, %v2356_v15, 0.0  ;;  %vm705_vm13 = vcmp.eq.s32.totalorder %v2675_v7, %v2428_v48 }
  0xcf   : > { %v688_v38 = vadd.f32 %v672_v37, %v638_v34  ;;  %v722_v39 = vsel %vm705_vm13, %v2361_v17, 0.0  ;;  %vm739_vm14 = vcmp.eq.s32.totalorder %v2675_v7, %v2437_v54  ;;  %vm789_vm15 = vcmp.eq.s32.totalorder %v2675_v7, %v2441_v58 }
  0xd0   : > { %v1282_v41 = vadd.f32 %v1266_v35, %v1250_v30  ;;  %v756_v44 = vsel %vm739_vm14, %v2363_v18, 0.0  ;;  %v806_v45 = vsel %vm789_vm15, %v2365_v19, 0.0  ;;  %vm823_vm0 = vcmp.eq.s32.totalorder %v2675_v7, %v2445_v59 }
  0xd1   : > { %v772_v47 = vadd.f32 %v756_v44, %v722_v39  ;;  %v840_v49 = vsel %vm823_vm0, %v2367_v20, 0.0  ;;  %v872_v61 = vadd.f32 %v688_v38, %v604_v36  ;;  %vm921_vm1 = vcmp.eq.s32.totalorder %v2678_v8, %v2369_v21 }
  0xd2   : > { %1594 = vmatpush.msra.mxu2 %v1282_v41  ;;  %v856_v52 = vadd.f32 %v840_v49, %v806_v45  ;;  %v937_v53 = vsel %vm921_vm1, %v2350_v12, 0.0  ;;  %vm955_vm2 = vcmp.eq.s32.totalorder %v2678_v8, %v2383_v28  ;;  %vm1004_vm3 = vcmp.eq.s32.totalorder %v2678_v8, %v2371_v23  ;;  %1297 = vmatpush.msra.mxu0 %v1282_v41 }
  0xd3   : > { %v971_v7 = vsel %vm955_vm2, %v2352_v13, 0.0  ;;  %v1020_v55 = vsel %vm1004_vm3, %v2354_v14, 0.0  ;;  %vm1037_vm4 = vcmp.eq.s32.totalorder %v2678_v8, %v2387_v29  ;;  %vm1086_vm5 = vcmp.eq.s32.totalorder %v2678_v8, %v2373_v24 }
  0xd4   : > { %v888_v56 = vadd.f32 %v856_v52, %v772_v47  ;;  %v987_v57 = vadd.f32 %v971_v7, %v937_v53  ;;  %v1053_v62 = vsel %vm1037_vm4, %v2356_v15, 0.0  ;;  %v1102_v60 = vsel %vm1086_vm5, %v2361_v17, 0.0 }
  0xd5   : > { %v1069_v63 = vadd.f32 %v1053_v62, %v1020_v55  ;;  %vm1119_vm6 = vcmp.eq.s32.totalorder %v2678_v8, %v2393_v32  ;;  %vm1168_vm7 = vcmp.eq.s32.totalorder %v2678_v8, %v2375_v25  ;;  %vm1201_vm8 = vcmp.eq.s32.totalorder %v2678_v8, %v2408_v40 }
  0xd6   : > { %v904_v0 = vadd.f32 %v888_v56, %v872_v61  ;;  %v1135_v1 = vsel %vm1119_vm6, %v2363_v18, 0.0  ;;  %v1184_v2 = vsel %vm1168_vm7, %v2365_v19, 0.0  ;;  %v1217_v3 = vsel %vm1201_vm8, %v2367_v20, 0.0 }
  0xd7   : > { %v1151_v4 = vadd.f32 %v1135_v1, %v1102_v60  ;;  %v1233_v5 = vadd.f32 %v1217_v3, %v1184_v2  ;;  %v1249_v6 = vadd.f32 %v1069_v63, %v987_v57  ;;  %vm535_vm9 = vcmp.eq.s32.totalorder %v2678_v8, %v2378_v26 }
  0xd8   : > { %1610 = vmatpush.msra.mxu3 %v904_v0  ;;  %v552_v51 = vsel %vm535_vm9, %v2350_v12, 0.0  ;;  %vm570_vm10 = vcmp.eq.s32.totalorder %v2678_v8, %v2412_v42  ;;  %vm620_vm11 = vcmp.eq.s32.totalorder %v2678_v8, %v2415_v43  ;;  %vm654_vm12 = vcmp.eq.s32.totalorder %v2678_v8, %v2420_v46  ;;  %1320 = vmatpush.msra.mxu1 %v904_v0 }
  0xd9   : > { %v1265_v9 = vadd.f32 %v1233_v5, %v1151_v4  ;;  %v587_v11 = vsel %vm570_vm10, %v2352_v13, 0.0  ;;  %v637_v16 = vsel %vm620_vm11, %v2354_v14, 0.0  ;;  %v671_v22 = vsel %vm654_vm12, %v2356_v15, 0.0 }
  0xda   : > { %v603_v27 = vadd.f32 %v587_v11, %v552_v51  ;;  %v687_v30 = vadd.f32 %v671_v22, %v637_v16  ;;  %vm704_vm13 = vcmp.eq.s32.totalorder %v2678_v8, %v2428_v48  ;;  %vm738_vm14 = vcmp.eq.s32.totalorder %v2678_v8, %v2437_v54 }
  0xdb   : > { %v1281_v50 = vadd.f32 %v1265_v9, %v1249_v6  ;;  %v721_v31 = vsel %vm704_vm13, %v2361_v17, 0.0  ;;  %v755_v33 = vsel %vm738_vm14, %v2363_v18, 0.0  ;;  %vm788_vm15 = vcmp.eq.s32.totalorder %v2678_v8, %v2441_v58 }
  0xdc   : > { %v771_v34 = vadd.f32 %v755_v33, %v721_v31  ;;  %v805_v35 = vsel %vm788_vm15, %v2365_v19, 0.0  ;;  %vm822_vm0 = vcmp.eq.s32.totalorder %v2678_v8, %v2445_v59  ;;  %v517_v37 = vadd.s32 48, %v2347_v10 }
  0xdd   : > { %1595 = vmatpush.msra.mxu2 %v1281_v50  ;;  %v839_v36 = vsel %vm822_vm0, %v2367_v20, 0.0  ;;  %1298 = vmatpush.msra.mxu0 %v1281_v50  ;;  %v871_v39 = vadd.f32 %v687_v30, %v603_v27  ;;  %v2810_v41 = vadd.s32 40, %v2347_v10  ;;  %v2813_v44 = vadd.s32 32, %v2347_v10 }
  0xde   : > { %v855_v38 = vadd.f32 %v839_v36, %v805_v35  ;;  %vm920_vm1 = vcmp.eq.s32.totalorder %v517_v37, %v2369_v21  ;;  %vm954_vm2 = vcmp.eq.s32.totalorder %v517_v37, %v2383_v28  ;;  %vm1003_vm3 = vcmp.eq.s32.totalorder %v517_v37, %v2371_v23 }
  0xdf   : > { %vm1036_vm4 = vcmp.eq.s32.totalorder %v517_v37, %v2387_v29  ;;  %v936_v45 = vsel %vm920_vm1, %v2350_v12, 0.0  ;;  %v970_v47 = vsel %vm954_vm2, %v2352_v13, 0.0  ;;  %v1019_v49 = vsel %vm1003_vm3, %v2354_v14, 0.0 }
  0xe0   : > { %v887_v8 = vadd.f32 %v855_v38, %v771_v34  ;;  %v986_v61 = vadd.f32 %v970_v47, %v936_v45  ;;  %v1052_v52 = vsel %vm1036_vm4, %v2356_v15, 0.0  ;;  %vm1085_vm5 = vcmp.eq.s32.totalorder %v517_v37, %v2373_v24 }
  0xe1   : > { %vm1118_vm6 = vcmp.eq.s32.totalorder %v517_v37, %v2393_v32  ;;  %v1068_v7 = vadd.f32 %v1052_v52, %v1019_v49  ;;  %v1101_v55 = vsel %vm1085_vm5, %v2361_v17, 0.0  ;;  %vm1167_vm7 = vcmp.eq.s32.totalorder %v517_v37, %v2375_v25 }
  0xe2   : > { %v903_v53 = vadd.f32 %v887_v8, %v871_v39  ;;  %v1134_v56 = vsel %vm1118_vm6, %v2363_v18, 0.0  ;;  %vm1200_vm8 = vcmp.eq.s32.totalorder %v517_v37, %v2408_v40  ;;  %vm534_vm9 = vcmp.eq.s32.totalorder %v517_v37, %v2378_v26 }
  0xe3   : > { %v1150_v57 = vadd.f32 %v1134_v56, %v1101_v55  ;;  %v1183_v62 = vsel %vm1167_vm7, %v2365_v19, 0.0  ;;  %v1216_v60 = vsel %vm1200_vm8, %v2367_v20, 0.0  ;;  %v1248_v63 = vadd.f32 %v1068_v7, %v986_v61 }
  0xe4   : > { %1611 = vmatpush.msra.mxu3 %v903_v53  ;;  %v551_v0 = vsel %vm534_vm9, %v2350_v12, 0.0  ;;  %1321 = vmatpush.msra.mxu1 %v903_v53  ;;  %v1232_v1 = vadd.f32 %v1216_v60, %v1183_v62  ;;  %vm569_vm10 = vcmp.eq.s32.totalorder %v517_v37, %v2412_v42  ;;  %vm619_vm11 = vcmp.eq.s32.totalorder %v517_v37, %v2415_v43 }
  0xe5   : > { %vm653_vm12 = vcmp.eq.s32.totalorder %v517_v37, %v2420_v46  ;;  %v586_v2 = vsel %vm569_vm10, %v2352_v13, 0.0  ;;  %v636_v3 = vsel %vm619_vm11, %v2354_v14, 0.0  ;;  %vm703_vm13 = vcmp.eq.s32.totalorder %v517_v37, %v2428_v48 }
  0xe6   : > { %v670_v4 = vsel %vm653_vm12, %v2356_v15, 0.0  ;;  %v1264_v5 = vadd.f32 %v1232_v1, %v1150_v57  ;;  %v602_v6 = vadd.f32 %v586_v2, %v551_v0  ;;  %v720_v9 = vsel %vm703_vm13, %v2361_v17, 0.0 }
  0xe7   : > { %v686_v51 = vadd.f32 %v670_v4, %v636_v3  ;;  %vm737_vm14 = vcmp.eq.s32.totalorder %v517_v37, %v2437_v54  ;;  %vm787_vm15 = vcmp.eq.s32.totalorder %v517_v37, %v2441_v58  ;;  %vm821_vm0 = vcmp.eq.s32.totalorder %v517_v37, %v2445_v59 }
  0xe8   : > { %vm919_vm1 = vcmp.eq.s32.totalorder %v2810_v41, %v2369_v21  ;;  %v1280_v11 = vadd.f32 %v1264_v5, %v1248_v63  ;;  %v754_v16 = vsel %vm737_vm14, %v2363_v18, 0.0  ;;  %v804_v22 = vsel %vm787_vm15, %v2365_v19, 0.0 }
  0xe9   : > { %v838_v27 = vsel %vm821_vm0, %v2367_v20, 0.0  ;;  %v770_v30 = vadd.f32 %v754_v16, %v720_v9  ;;  %v870_v31 = vadd.f32 %v686_v51, %v602_v6  ;;  %v935_v33 = vsel %vm919_vm1, %v2350_v12, 0.0 }
  0xea   : > { %v854_v50 = vadd.f32 %v838_v27, %v804_v22  ;;  %1596 = vmatpush.msra.mxu2 %v1280_v11  ;;  %vm953_vm2 = vcmp.eq.s32.totalorder %v2810_v41, %v2383_v28  ;;  %vm1002_vm3 = vcmp.eq.s32.totalorder %v2810_v41, %v2371_v23  ;;  %vm1035_vm4 = vcmp.eq.s32.totalorder %v2810_v41, %v2387_v29 }
  0xeb   : > { %vm1084_vm5 = vcmp.eq.s32.totalorder %v2810_v41, %v2373_v24  ;;  %v969_v35 = vsel %vm953_vm2, %v2352_v13, 0.0  ;;  %v1018_v36 = vsel %vm1002_vm3, %v2354_v14, 0.0  ;;  %v1051_v37 = vsel %vm1035_vm4, %v2356_v15, 0.0  ;;  %1299 = vmatpush.msra.mxu0 %v1280_v11 }
  0xec   : > { %v886_v34 = vadd.f32 %v854_v50, %v770_v30  ;;  %v985_v38 = vadd.f32 %v969_v35, %v935_v33  ;;  %v1067_v39 = vadd.f32 %v1051_v37, %v1018_v36  ;;  %v1100_v8 = vsel %vm1084_vm5, %v2361_v17, 0.0 }
  0xed   : > { %vm1117_vm6 = vcmp.eq.s32.totalorder %v2810_v41, %v2393_v32  ;;  %vm1166_vm7 = vcmp.eq.s32.totalorder %v2810_v41, %v2375_v25  ;;  %vm1199_vm8 = vcmp.eq.s32.totalorder %v2810_v41, %v2408_v40  ;;  %vm533_vm9 = vcmp.eq.s32.totalorder %v2810_v41, %v2378_v26 }
  0xee   : > { %v902_v45 = vadd.f32 %v886_v34, %v870_v31  ;;  %v1133_v47 = vsel %vm1117_vm6, %v2363_v18, 0.0  ;;  %v1182_v61 = vsel %vm1166_vm7, %v2365_v19, 0.0  ;;  %v1215_v52 = vsel %vm1199_vm8, %v2367_v20, 0.0 }
  0xef   : > { %v1149_v49 = vadd.f32 %v1133_v47, %v1100_v8  ;;  %v1247_v53 = vadd.f32 %v1067_v39, %v985_v38  ;;  %v1231_v7 = vadd.f32 %v1215_v52, %v1182_v61  ;;  %vm568_vm10 = vcmp.eq.s32.totalorder %v2810_v41, %v2412_v42 }
  0xf0   : > { %1612 = vmatpush.msra.mxu3 %v902_v45  ;;  %vm618_vm11 = vcmp.eq.s32.totalorder %v2810_v41, %v2415_v43  ;;  %v550_v55 = vsel %vm533_vm9, %v2350_v12, 0.0  ;;  %v585_v56 = vsel %vm568_vm10, %v2352_v13, 0.0  ;;  %vm652_vm12 = vcmp.eq.s32.totalorder %v2810_v41, %v2420_v46  ;;  %1322 = vmatpush.msra.mxu1 %v902_v45 }
  0xf1   : > { %v635_v57 = vsel %vm618_vm11, %v2354_v14, 0.0  ;;  %v1263_v62 = vadd.f32 %v1231_v7, %v1149_v49  ;;  %v601_v60 = vadd.f32 %v585_v56, %v550_v55  ;;  %v669_v63 = vsel %vm652_vm12, %v2356_v15, 0.0 }
  0xf2   : > { %vm702_vm13 = vcmp.eq.s32.totalorder %v2810_v41, %v2428_v48  ;;  %v685_v0 = vadd.f32 %v669_v63, %v635_v57  ;;  %vm736_vm14 = vcmp.eq.s32.totalorder %v2810_v41, %v2437_v54  ;;  %vm786_vm15 = vcmp.eq.s32.totalorder %v2810_v41, %v2441_v58 }
  0xf3   : > { %v719_v1 = vsel %vm702_vm13, %v2361_v17, 0.0  ;;  %v1279_v2 = vadd.f32 %v1263_v62, %v1247_v53  ;;  %v753_v3 = vsel %vm736_vm14, %v2363_v18, 0.0  ;;  %v803_v4 = vsel %vm786_vm15, %v2365_v19, 0.0 }
  0xf4   : > { %vm820_vm0 = vcmp.eq.s32.totalorder %v2810_v41, %v2445_v59  ;;  %v769_v5 = vadd.f32 %v753_v3, %v719_v1  ;;  %v869_v51 = vadd.f32 %v685_v0, %v601_v60  ;;  %vm918_vm1 = vcmp.eq.s32.totalorder %v2813_v44, %v2369_v21 }
  0xf5   : > { %v837_v6 = vsel %vm820_vm0, %v2367_v20, 0.0  ;;  %1597 = vmatpush.msra.mxu2 %v1279_v2  ;;  %v934_v11 = vsel %vm918_vm1, %v2350_v12, 0.0  ;;  %vm952_vm2 = vcmp.eq.s32.totalorder %v2813_v44, %v2383_v28  ;;  %vm1001_vm3 = vcmp.eq.s32.totalorder %v2813_v44, %v2371_v23  ;;  %1300 = vmatpush.msra.mxu0 %v1279_v2 }
  0xf6   : > { %v853_v9 = vadd.f32 %v837_v6, %v803_v4  ;;  %v968_v41 = vsel %vm952_vm2, %v2352_v13, 0.0  ;;  %v1017_v16 = vsel %vm1001_vm3, %v2354_v14, 0.0  ;;  %vm1034_vm4 = vcmp.eq.s32.totalorder %v2813_v44, %v2387_v29 }
  0xf7   : > { %vm1083_vm5 = vcmp.eq.s32.totalorder %v2813_v44, %v2373_v24  ;;  %v984_v27 = vadd.f32 %v968_v41, %v934_v11  ;;  %v1050_v30 = vsel %vm1034_vm4, %v2356_v15, 0.0  ;;  %vm1116_vm6 = vcmp.eq.s32.totalorder %v2813_v44, %v2393_v32 }
  0xf8   : > { %v885_v22 = vadd.f32 %v853_v9, %v769_v5  ;;  %v1099_v50 = vsel %vm1083_vm5, %v2361_v17, 0.0  ;;  %v1066_v31 = vadd.f32 %v1050_v30, %v1017_v16  ;;  %vm1165_vm7 = vcmp.eq.s32.totalorder %v2813_v44, %v2375_v25 }
  0xf9   : > { %vm1198_vm8 = vcmp.eq.s32.totalorder %v2813_v44, %v2408_v40  ;;  %v1132_v34 = vsel %vm1116_vm6, %v2363_v18, 0.0  ;;  %v1181_v35 = vsel %vm1165_vm7, %v2365_v19, 0.0  ;;  %vm532_vm9 = vcmp.eq.s32.totalorder %v2813_v44, %v2378_v26 }
  0xfa   : > { %v901_v33 = vadd.f32 %v885_v22, %v869_v51  ;;  %v1214_v36 = vsel %vm1198_vm8, %v2367_v20, 0.0  ;;  %v1148_v37 = vadd.f32 %v1132_v34, %v1099_v50  ;;  %v1246_v39 = vadd.f32 %v1066_v31, %v984_v27 }
  0xfb   : > { %v1230_v38 = vadd.f32 %v1214_v36, %v1181_v35  ;;  %v549_v8 = vsel %vm532_vm9, %v2350_v12, 0.0  ;;  %vm567_vm10 = vcmp.eq.s32.totalorder %v2813_v44, %v2412_v42  ;;  %vm617_vm11 = vcmp.eq.s32.totalorder %v2813_v44, %v2415_v43 }
  0xfc   : > { %1613 = vmatpush.msra.mxu3 %v901_v33  ;;  %vm651_vm12 = vcmp.eq.s32.totalorder %v2813_v44, %v2420_v46  ;;  %1323 = vmatpush.msra.mxu1 %v901_v33  ;;  %v584_v47 = vsel %vm567_vm10, %v2352_v13, 0.0  ;;  %v634_v49 = vsel %vm617_vm11, %v2354_v14, 0.0  ;;  %vm701_vm13 = vcmp.eq.s32.totalorder %v2813_v44, %v2428_v48 }
  0xfd   : > { %v1262_v45 = vadd.f32 %v1230_v38, %v1148_v37  ;;  %v668_v61 = vsel %vm651_vm12, %v2356_v15, 0.0  ;;  %v600_v52 = vadd.f32 %v584_v47, %v549_v8  ;;  %vm735_vm14 = vcmp.eq.s32.totalorder %v2813_v44, %v2437_v54 }
  0xfe   : > { %v684_v53 = vadd.f32 %v668_v61, %v634_v49  ;;  %v718_v55 = vsel %vm701_vm13, %v2361_v17, 0.0  ;;  %v752_v56 = vsel %vm735_vm14, %v2363_v18, 0.0  ;;  %vm785_vm15 = vcmp.eq.s32.totalorder %v2813_v44, %v2441_v58 }
  0xff   : > { %v1278_v7 = vadd.f32 %v1262_v45, %v1246_v39  ;;  %v768_v57 = vadd.f32 %v752_v56, %v718_v55  ;;  %v802_v62 = vsel %vm785_vm15, %v2365_v19, 0.0  ;;  %vm819_vm0 = vcmp.eq.s32.totalorder %v2813_v44, %v2445_v59 }
 0x100   : > { %v836_v60 = vsel %vm819_vm0, %v2367_v20, 0.0  ;;  %v514_v63 = vadd.s32 24, %v2347_v10  ;;  %v868_v1 = vadd.f32 %v684_v53, %v600_v52  ;;  %v2945_v2 = vadd.s32 16, %v2347_v10 }
 0x101   : > { %1598 = vmatpush.msra.mxu2 %v1278_v7  ;;  %1301 = vmatpush.msra.mxu0 %v1278_v7  ;;  %v852_v0 = vadd.f32 %v836_v60, %v802_v62  ;;  %v2948_v3 = vadd.s32 8, %v2347_v10 }
 0x102   : > { %vm917_vm1 = vcmp.eq.s32.totalorder %v514_v63, %v2369_v21  ;;  %vm951_vm2 = vcmp.eq.s32.totalorder %v514_v63, %v2383_v28  ;;  %vm1000_vm3 = vcmp.eq.s32.totalorder %v514_v63, %v2371_v23  ;;  %vm1033_vm4 = vcmp.eq.s32.totalorder %v514_v63, %v2387_v29 }
 0x103   : > { %v884_v44 = vadd.f32 %v852_v0, %v768_v57  ;;  %v933_v4 = vsel %vm917_vm1, %v2350_v12, 0.0  ;;  %v967_v5 = vsel %vm951_vm2, %v2352_v13, 0.0  ;;  %v1016_v6 = vsel %vm1000_vm3, %v2354_v14, 0.0 }
 0x104   : > { %v983_v51 = vadd.f32 %v967_v5, %v933_v4  ;;  %v1049_v9 = vsel %vm1033_vm4, %v2356_v15, 0.0  ;;  %vm1082_vm5 = vcmp.eq.s32.totalorder %v514_v63, %v2373_v24  ;;  %vm1115_vm6 = vcmp.eq.s32.totalorder %v514_v63, %v2393_v32 }
 0x105   : > { %v900_v11 = vadd.f32 %v884_v44, %v868_v1  ;;  %v1065_v41 = vadd.f32 %v1049_v9, %v1016_v6  ;;  %v1098_v16 = vsel %vm1082_vm5, %v2361_v17, 0.0  ;;  %v1131_v22 = vsel %vm1115_vm6, %v2363_v18, 0.0 }
 0x106   : > { %v1147_v27 = vadd.f32 %v1131_v22, %v1098_v16  ;;  %vm1164_vm7 = vcmp.eq.s32.totalorder %v514_v63, %v2375_v25  ;;  %vm1197_vm8 = vcmp.eq.s32.totalorder %v514_v63, %v2408_v40  ;;  %vm531_vm9 = vcmp.eq.s32.totalorder %v514_v63, %v2378_v26 }
 0x107   : > { %1614 = vmatpush.msra.mxu3 %v900_v11  ;;  %v1180_v30 = vsel %vm1164_vm7, %v2365_v19, 0.0  ;;  %v1213_v50 = vsel %vm1197_vm8, %v2367_v20, 0.0  ;;  %v1245_v31 = vadd.f32 %v1065_v41, %v983_v51  ;;  %v548_v33 = vsel %vm531_vm9, %v2350_v12, 0.0  ;;  %1324 = vmatpush.msra.mxu1 %v900_v11 }
 0x108   : > { %v1229_v34 = vadd.f32 %v1213_v50, %v1180_v30  ;;  %vm566_vm10 = vcmp.eq.s32.totalorder %v514_v63, %v2412_v42  ;;  %vm616_vm11 = vcmp.eq.s32.totalorder %v514_v63, %v2415_v43  ;;  %vm650_vm12 = vcmp.eq.s32.totalorder %v514_v63, %v2420_v46 }
 0x109   : > { %v583_v35 = vsel %vm566_vm10, %v2352_v13, 0.0  ;;  %v633_v36 = vsel %vm616_vm11, %v2354_v14, 0.0  ;;  %v667_v37 = vsel %vm650_vm12, %v2356_v15, 0.0  ;;  %vm700_vm13 = vcmp.eq.s32.totalorder %v514_v63, %v2428_v48 }
 0x10a   : > { %v1261_v38 = vadd.f32 %v1229_v34, %v1147_v27  ;;  %v599_v39 = vadd.f32 %v583_v35, %v548_v33  ;;  %v683_v8 = vadd.f32 %v667_v37, %v633_v36  ;;  %v717_v45 = vsel %vm700_vm13, %v2361_v17, 0.0 }
 0x10b   : > { %vm734_vm14 = vcmp.eq.s32.totalorder %v514_v63, %v2437_v54  ;;  %vm784_vm15 = vcmp.eq.s32.totalorder %v514_v63, %v2441_v58  ;;  %vm818_vm0 = vcmp.eq.s32.totalorder %v514_v63, %v2445_v59  ;;  %vm916_vm1 = vcmp.eq.s32.totalorder %v2945_v2, %v2369_v21 }
 0x10c   : > { %v1277_v47 = vadd.f32 %v1261_v38, %v1245_v31  ;;  %v751_v49 = vsel %vm734_vm14, %v2363_v18, 0.0  ;;  %v801_v61 = vsel %vm784_vm15, %v2365_v19, 0.0  ;;  %v835_v52 = vsel %vm818_vm0, %v2367_v20, 0.0 }
 0x10d   : > { %v767_v53 = vadd.f32 %v751_v49, %v717_v45  ;;  %v851_v7 = vadd.f32 %v835_v52, %v801_v61  ;;  %v867_v55 = vadd.f32 %v683_v8, %v599_v39  ;;  %v932_v56 = vsel %vm916_vm1, %v2350_v12, 0.0 }
 0x10e   : > { %1599 = vmatpush.msra.mxu2 %v1277_v47  ;;  %vm950_vm2 = vcmp.eq.s32.totalorder %v2945_v2, %v2383_v28  ;;  %vm999_vm3 = vcmp.eq.s32.totalorder %v2945_v2, %v2371_v23  ;;  %vm1032_vm4 = vcmp.eq.s32.totalorder %v2945_v2, %v2387_v29  ;;  %vm1081_vm5 = vcmp.eq.s32.totalorder %v2945_v2, %v2373_v24 }
 0x10f   : > { %v883_v57 = vadd.f32 %v851_v7, %v767_v53  ;;  %v966_v62 = vsel %vm950_vm2, %v2352_v13, 0.0  ;;  %v1015_v60 = vsel %vm999_vm3, %v2354_v14, 0.0  ;;  %v1048_v63 = vsel %vm1032_vm4, %v2356_v15, 0.0  ;;  %1302 = vmatpush.msra.mxu0 %v1277_v47 }
 0x110   : > { %v982_v0 = vadd.f32 %v966_v62, %v932_v56  ;;  %v1064_v1 = vadd.f32 %v1048_v63, %v1015_v60  ;;  %v1097_v44 = vsel %vm1081_vm5, %v2361_v17, 0.0  ;;  %vm1114_vm6 = vcmp.eq.s32.totalorder %v2945_v2, %v2393_v32 }
 0x111   : > { %v899_v4 = vadd.f32 %v883_v57, %v867_v55  ;;  %v1130_v5 = vsel %vm1114_vm6, %v2363_v18, 0.0  ;;  %vm1163_vm7 = vcmp.eq.s32.totalorder %v2945_v2, %v2375_v25  ;;  %vm1196_vm8 = vcmp.eq.s32.totalorder %v2945_v2, %v2408_v40 }
 0x112   : > { %v1146_v6 = vadd.f32 %v1130_v5, %v1097_v44  ;;  %v1179_v51 = vsel %vm1163_vm7, %v2365_v19, 0.0  ;;  %v1212_v9 = vsel %vm1196_vm8, %v2367_v20, 0.0  ;;  %v1244_v11 = vadd.f32 %v1064_v1, %v982_v0 }
 0x113   : > { %1615 = vmatpush.msra.mxu3 %v899_v4  ;;  %v1228_v41 = vadd.f32 %v1212_v9, %v1179_v51  ;;  %vm530_vm9 = vcmp.eq.s32.totalorder %v2945_v2, %v2378_v26  ;;  %vm565_vm10 = vcmp.eq.s32.totalorder %v2945_v2, %v2412_v42  ;;  %vm615_vm11 = vcmp.eq.s32.totalorder %v2945_v2, %v2415_v43 }
 0x114   : > { %v547_v16 = vsel %vm530_vm9, %v2350_v12, 0.0  ;;  %v582_v22 = vsel %vm565_vm10, %v2352_v13, 0.0  ;;  %v632_v27 = vsel %vm615_vm11, %v2354_v14, 0.0  ;;  %vm649_vm12 = vcmp.eq.s32.totalorder %v2945_v2, %v2420_v46  ;;  %1325 = vmatpush.msra.mxu1 %v899_v4 }
 0x115   : > { %v1260_v30 = vadd.f32 %v1228_v41, %v1146_v6  ;;  %v598_v50 = vadd.f32 %v582_v22, %v547_v16  ;;  %v666_v31 = vsel %vm649_vm12, %v2356_v15, 0.0  ;;  %vm699_vm13 = vcmp.eq.s32.totalorder %v2945_v2, %v2428_v48 }
 0x116   : > { %v682_v33 = vadd.f32 %v666_v31, %v632_v27  ;;  %v716_v34 = vsel %vm699_vm13, %v2361_v17, 0.0  ;;  %vm733_vm14 = vcmp.eq.s32.totalorder %v2945_v2, %v2437_v54  ;;  %vm783_vm15 = vcmp.eq.s32.totalorder %v2945_v2, %v2441_v58 }
 0x117   : > { %v1276_v35 = vadd.f32 %v1260_v30, %v1244_v11  ;;  %v750_v36 = vsel %vm733_vm14, %v2363_v18, 0.0  ;;  %v800_v37 = vsel %vm783_vm15, %v2365_v19, 0.0  ;;  %vm817_vm0 = vcmp.eq.s32.totalorder %v2945_v2, %v2445_v59 }
 0x118   : > { %v766_v38 = vadd.f32 %v750_v36, %v716_v34  ;;  %v834_v39 = vsel %vm817_vm0, %v2367_v20, 0.0  ;;  %v866_v8 = vadd.f32 %v682_v33, %v598_v50  ;;  %vm915_vm1 = vcmp.eq.s32.totalorder %v2948_v3, %v2369_v21 }
 0x119   : > { %1600 = vmatpush.msra.mxu2 %v1276_v35  ;;  %v850_v45 = vadd.f32 %v834_v39, %v800_v37  ;;  %v931_v47 = vsel %vm915_vm1, %v2350_v12, 0.0  ;;  %vm949_vm2 = vcmp.eq.s32.totalorder %v2948_v3, %v2383_v28  ;;  %vm998_vm3 = vcmp.eq.s32.totalorder %v2948_v3, %v2371_v23  ;;  %1303 = vmatpush.msra.mxu0 %v1276_v35 }
 0x11a   : > { %v965_v2 = vsel %vm949_vm2, %v2352_v13, 0.0  ;;  %v1014_v49 = vsel %vm998_vm3, %v2354_v14, 0.0  ;;  %vm1031_vm4 = vcmp.eq.s32.totalorder %v2948_v3, %v2387_v29  ;;  %vm1080_vm5 = vcmp.eq.s32.totalorder %v2948_v3, %v2373_v24 }
 0x11b   : > { %v882_v61 = vadd.f32 %v850_v45, %v766_v38  ;;  %v981_v52 = vadd.f32 %v965_v2, %v931_v47  ;;  %v1047_v53 = vsel %vm1031_vm4, %v2356_v15, 0.0  ;;  %v1096_v7 = vsel %vm1080_vm5, %v2361_v17, 0.0 }
 0x11c   : > { %v1063_v55 = vadd.f32 %v1047_v53, %v1014_v49  ;;  %vm1113_vm6 = vcmp.eq.s32.totalorder %v2948_v3, %v2393_v32  ;;  %vm1162_vm7 = vcmp.eq.s32.totalorder %v2948_v3, %v2375_v25  ;;  %vm1195_vm8 = vcmp.eq.s32.totalorder %v2948_v3, %v2408_v40 }
 0x11d   : > { %v898_v56 = vadd.f32 %v882_v61, %v866_v8  ;;  %v1129_v57 = vsel %vm1113_vm6, %v2363_v18, 0.0  ;;  %v1178_v62 = vsel %vm1162_vm7, %v2365_v19, 0.0  ;;  %v1211_v60 = vsel %vm1195_vm8, %v2367_v20, 0.0 }
 0x11e   : > { %v1145_v63 = vadd.f32 %v1129_v57, %v1096_v7  ;;  %v1227_v0 = vadd.f32 %v1211_v60, %v1178_v62  ;;  %v1243_v1 = vadd.f32 %v1063_v55, %v981_v52  ;;  %vm529_vm9 = vcmp.eq.s32.totalorder %v2948_v3, %v2378_v26  ;;  %v506_v52 = vld [vmem:[%s2331_s16] sm:$0xff]  ;;  %v1337_v57 = vld [vmem:[%s2339_s10 + $0x10] sm:$0xff] }
 0x11f   : > { %1616 = vmatpush.msra.mxu3 %v898_v56  ;;  %v546_v44 = vsel %vm529_vm9, %v2350_v12, 0.0  ;;  %vm564_vm10 = vcmp.eq.s32.totalorder %v2948_v3, %v2412_v42  ;;  %vm614_vm11 = vcmp.eq.s32.totalorder %v2948_v3, %v2415_v43  ;;  %vm648_vm12 = vcmp.eq.s32.totalorder %v2948_v3, %v2420_v46  ;;  %1326 = vmatpush.msra.mxu1 %v898_v56 }
 0x120   : > { %v1259_v4 = vadd.f32 %v1227_v0, %v1145_v63  ;;  %v581_v5 = vsel %vm564_vm10, %v2352_v13, 0.0  ;;  %v631_v6 = vsel %vm614_vm11, %v2354_v14, 0.0  ;;  %v665_v51 = vsel %vm648_vm12, %v2356_v15, 0.0 }
 0x121   : > { %v597_v9 = vadd.f32 %v581_v5, %v546_v44  ;;  %v681_v11 = vadd.f32 %v665_v51, %v631_v6  ;;  %vm698_vm13 = vcmp.eq.s32.totalorder %v2948_v3, %v2428_v48  ;;  %vm732_vm14 = vcmp.eq.s32.totalorder %v2948_v3, %v2437_v54 }
 0x122   : > { %v1275_v41 = vadd.f32 %v1259_v4, %v1243_v1  ;;  %v715_v16 = vsel %vm698_vm13, %v2361_v17, 0.0  ;;  %v749_v22 = vsel %vm732_vm14, %v2363_v18, 0.0  ;;  %vm782_vm15 = vcmp.eq.s32.totalorder %v2948_v3, %v2441_v58 }
 0x123   : > { %v765_v27 = vadd.f32 %v749_v22, %v715_v16  ;;  %v799_v30 = vsel %vm782_vm15, %v2365_v19, 0.0  ;;  %vm816_vm0 = vcmp.eq.s32.totalorder %v2948_v3, %v2445_v59  ;;  %v865_v50 = vadd.f32 %v681_v11, %v597_v9 }
 0x124   : > { %1601 = vmatpush.msra.mxu2 %v1275_v41  ;;  %v833_v31 = vsel %vm816_vm0, %v2367_v20, 0.0  ;;  %vm914_vm1 = vcmp.eq.s32.totalorder %v2347_v10, %v2369_v21  ;;  %vm948_vm2 = vcmp.eq.s32.totalorder %v2347_v10, %v2383_v28  ;;  %vm997_vm3 = vcmp.eq.s32.totalorder %v2347_v10, %v2371_v23  ;;  %1304 = vmatpush.msra.mxu0 %v1275_v41 }
 0x125   : > { %v849_v33 = vadd.f32 %v833_v31, %v799_v30  ;;  %v930_v34 = vsel %vm914_vm1, %v2350_v12, 0.0  ;;  %v964_v35 = vsel %vm948_vm2, %v2352_v13, 0.0  ;;  %v1013_v3 = vsel %vm997_vm3, %v2354_v14, 0.0 }
 0x126   : > { %v980_v36 = vadd.f32 %v964_v35, %v930_v34  ;;  %vm1030_vm4 = vcmp.eq.s32.totalorder %v2347_v10, %v2387_v29  ;;  %vm1079_vm5 = vcmp.eq.s32.totalorder %v2347_v10, %v2373_v24  ;;  %vm1112_vm6 = vcmp.eq.s32.totalorder %v2347_v10, %v2393_v32 }
 0x127   : > { %v881_v21 = vadd.f32 %v849_v33, %v765_v27  ;;  %v1046_v23 = vsel %vm1030_vm4, %v2356_v15, 0.0  ;;  %v1095_v28 = vsel %vm1079_vm5, %v2361_v17, 0.0  ;;  %v1128_v37 = vsel %vm1112_vm6, %v2363_v18, 0.0 }
 0x128   : > { %v1062_v38 = vadd.f32 %v1046_v23, %v1013_v3  ;;  %v1144_v39 = vadd.f32 %v1128_v37, %v1095_v28  ;;  %vm1161_vm7 = vcmp.eq.s32.totalorder %v2347_v10, %v2375_v25  ;;  %vm1194_vm8 = vcmp.eq.s32.totalorder %v2347_v10, %v2408_v40 }
 0x129   : > { %v897_v29 = vadd.f32 %v881_v21, %v865_v50  ;;  %v1177_v24 = vsel %vm1161_vm7, %v2365_v19, 0.0  ;;  %v1210_v32 = vsel %vm1194_vm8, %v2367_v20, 0.0  ;;  %vm528_vm9 = vcmp.eq.s32.totalorder %v2347_v10, %v2378_v26 }
 0x12a   : > { %v1226_v8 = vadd.f32 %v1210_v32, %v1177_v24  ;;  %v1242_v45 = vadd.f32 %v1062_v38, %v980_v36  ;;  %v545_v47 = vsel %vm528_vm9, %v2350_v12, 0.0  ;;  %vm563_vm10 = vcmp.eq.s32.totalorder %v2347_v10, %v2412_v42 }
 0x12b   : > { %1617 = vmatpush.msra.mxu3 %v897_v29  ;;  %v580_v25 = vsel %vm563_vm10, %v2352_v13, 0.0  ;;  %vm613_vm11 = vcmp.eq.s32.totalorder %v2347_v10, %v2415_v43  ;;  %vm647_vm12 = vcmp.eq.s32.totalorder %v2347_v10, %v2420_v46  ;;  %vm697_vm13 = vcmp.eq.s32.totalorder %v2347_v10, %v2428_v48  ;;  %1327 = vmatpush.msra.mxu1 %v897_v29 }
 0x12c   : > { %v1258_v26 = vadd.f32 %v1226_v8, %v1144_v39  ;;  %v596_v12 = vadd.f32 %v580_v25, %v545_v47  ;;  %v630_v40 = vsel %vm613_vm11, %v2354_v14, 0.0  ;;  %v664_v42 = vsel %vm647_vm12, %v2356_v15, 0.0  ;;  %v509_v14 = vld [vmem:[%s2331_s16 + $0x18] sm:$0xff]  ;;  %v507_v15 = vld [vmem:[%s2331_s16 + $0x8] sm:$0xff] }
 0x12d   : > { %v680_v2 = vadd.f32 %v664_v42, %v630_v40  ;;  %v714_v13 = vsel %vm697_vm13, %v2361_v17, 0.0  ;;  %vm731_vm14 = vcmp.eq.s32.totalorder %v2347_v10, %v2437_v54  ;;  %vm781_vm15 = vcmp.eq.s32.totalorder %v2347_v10, %v2441_v58 }
 0x12e   : > { %v1274_v43 = vadd.f32 %v1258_v26, %v1242_v45  ;;  %v748_v46 = vsel %vm731_vm14, %v2363_v18, 0.0  ;;  %v798_v48 = vsel %vm781_vm15, %v2365_v19, 0.0  ;;  %vm815_vm0 = vcmp.eq.s32.totalorder %v2347_v10, %v2445_v59  ;;  %v508_v19 = vld [vmem:[%s2331_s16 + $0x10] sm:$0xff]  ;;  %v1336_v59 = vld [vmem:[%s2339_s10 + $0x8] sm:$0xff]  ;;  %s1947_s16 = sshra.s32 %s1357_s9, 4  ;;  %s1948_s16 = int_to_ptr.hbm [resolvable:$true] %s1947_s16 }
 0x12f   : > { %v764_v49 = vadd.f32 %v748_v46, %v714_v13  ;;  %v832_v17 = vsel %vm815_vm0, %v2367_v20, 0.0  ;;  %v864_v58 = vadd.f32 %v680_v2, %v596_v12  ;;  %s1949_s12 = scalar_lea.hbm %s1948_s16, 24  ;;  %p1954_p4 = scmp.lt.s32.totalorder %s1948_s16, %s3232_s14 }
 0x130   : > { %1602 = vmatpush.msra.mxu2 %v1274_v43  ;;  %v848_v54 = vadd.f32 %v832_v17, %v798_v48  ;;  %1305 = vmatpush.msra.mxu0 %v1274_v43  ;;  %p1950_p6 = scmp.ne.s32.totalorder %s1948_s16, %s1949_s12  ;;  %p1955_p5 = scmp.lt.s32.totalorder %s1953_s21, %s1949_s12 }
 0x131   : > { %1309 = vmatmul.f32.vlgmr.msra.gmra.mxu2 %v509_v14  ;;  %1306 = vmatmul.f32.vlgmr.msra.gmra.mxu0 %v507_v15 }
 0x132   : > { %v880_v18 = vadd.f32 %v848_v54, %v764_v49  ;;  %p1951_p0 = pnand %p1950_p6, %p2186_p8  ;;  %p1956_p7 = por %p1955_p5, %p1954_p4 }
 0x134   : > { %v896_v61 = vadd.f32 %v880_v18, %v864_v58  ;;  %p1952_p2 = pneg %p1951_p0 }
 0x136   : > { %1618 = vmatpush.msra.mxu3 %v896_v61  ;;  %1328 = vmatpush.msra.mxu1 %v896_v61  ;;  %p1957_p11 = pnand %p1956_p7, %p1952_p2 }
 0x137   : > { %1332 = vmatmul.f32.vlgmr.msra.gmra.mxu3 %v508_v19  ;;  %1329 = vmatmul.f32.vlgmr.msra.gmra.mxu1 %v506_v52 }
 0x1ae   : > { %v1307_v10 = vpop.f32.mrf.mxu0 }
 0x1b4   : > { %v1330_v20 = vpop.f32.mrf.mxu1  ;;  %v1310_v55 = vpop.f32.mrf.mxu2 }
 0x1b5   : > { %v1331_v53 = vadd.f32 %v1330_v20, %v1307_v10 }
 0x1b7   : > { %v1338_v7 = vadd.f32 %v1336_v59, %v1331_v53 }
 0x1b9   : > { %1340 = vst [vmem:[%s2339_s10 + $0x8] sm:$0xff] %v1338_v7 }
 0x1ba   : > { %v1333_v56 = vpop.f32.mrf.mxu3 }
 0x1bb   : > { %v1334_v62 = vadd.f32 %v1333_v56, %v1310_v55 }
 0x1bd   : > { %v1339_v60 = vadd.f32 %v1337_v57, %v1334_v62 }
 0x1bf   : > { %1341 = vst [vmem:[%s2339_s10 + $0x10] sm:$0xff] %v1339_v60 }
 0x1c0   : > { %1960 = shalt.err (!%p1957_p11)
}
 0x1c1   : > { %s2072_s3 = smov 128   ;;  %s2073_s10 = smov 256  }
 0x1c2   : > { %s2074_s24 = smov 8  }
 0x1c3   : > { %1632 = dma.vmem_to_hbm [thread:$0]  (%p2186_p8), %s1355_s19, 384, %s1357_s9, %s1343_s1, %s2072_s3, %s2073_s10, %s2074_s24  }
 0x1c4 PF: > { %s3234_s28 = sld [smem:[#allocation19_spill]]  ;;  %p1658_p12 = scmp.ge.s32.totalorder %s2067_s7, 2 }
 0x1c6   : > { %p1654_p13 = pnand %p1658_p12, %p2190_p9 }
 0x1c8   : > { %p1655_p1 = pneg %p1654_p13 }
 0x1ca   : > { %s1371_s13 = sand.u32 1, %s3234_s28  }
 0x1cb   : > { %s1372_s16 = scalar_lea.sflag [#allocation4], %s1371_s13 }
 0x1cc   : > { %2022 = dma.done.wait (%p1655_p1), %s1372_s16, 384  }
 0x1cd   : > { %2024 = vsyncadd (%p1655_p1), %s1372_s16, 4294966912  ;;  %s31_s7 = sadd.s32 1, %s2067_s7   ;;  %s3236_s24 = sld [smem:[#allocation20_spill]] }
 0x1ce   : > { %p28_p3 = scmp.ge.s32.totalorder %s31_s7, 6   ;;  %s3237_s8 = smov %s2294_s25 }
 0x1cf   : > { %s3238_s21 = smov %s2031_s22  ;;  %s3239_s22 = smov %s2035_s23 }
 0x1d0   : > { %s3240_s23 = smov %s2286_s27  ;;  %s3241_s25 = smov %s2047_s26 }
 0x1d1   : > { %s3242_s26 = smov %s3237_s8  ;;  %s3243_s27 = smov %s2059_s29 }
 0x1d2   : > { %s3244_s28 = smov %s2063_s30  ;;  %s3245_s29 = smov %s3248_s20 }
 0x1d3   : > { %s3246_s30 = smov %s3252_s18  ;;  %30 = sbr.rel (!%p28_p3) target bundleno = 19 (0x13), region = 154 }
 0x1d8   :  { %1378 = vsyncpa [#allocation3], 1 }
 0x1d9   :  { %1380 = vsyncpa [#allocation3 + $0x1], 1 }
 0x1da   :  { %1381 = vsyncpa [#allocation6], 1 }
 0x1db   :  { %1383 = vsyncpa [#allocation6 + $0x1], 1 }
 0x1dc   :  { %1384 = vsyncpa [#allocation9], 1 }
 0x1dd   :  { %1386 = vsyncpa [#allocation9 + $0x1], 1 }
 0x1de   :  { %1387 = vsyncpa [#allocation12], 1 }
 0x1df   :  { %1389 = vsyncpa [#allocation12 + $0x1], 1 }
 0x1e0   :  { %1390 = vsyncpa [#allocation4], 1 }
 0x1e1   :  { %1392 = vsyncpa [#allocation4 + $0x1], 1 }

</bundles_post_ra>
